<compile_context>
chip_gen: v7x
topology: tpu7x:2x2x1
jax: 0.10.0
libtpu: 0.0.40
codegen_flags: <defaults>
</compile_context>

<pallas_src>
import functools
import math

import jax
import jax.numpy as jnp
from jax import lax
from jax.experimental import pallas as pl
from jax.experimental.pallas import tpu as pltpu


def _textcnn_fused_kernel(x_ref, w_ref, b_ref, lvalid_ref, o_ref, *, k_eff, l_out):
    # x_ref:      (bt, l_pad, E)     time-padded input tile (f32 or bf16)
    # w_ref:      (k_eff*E, F_PAD)   packed im2col weights (zero-padded taps/cols)
    # b_ref:      (1, F_PAD)         packed biases (zero-padded)
    # lvalid_ref: (1, F_PAD) int32   #valid time positions per packed column
    # o_ref:      (bt, F_PAD)        fused, lane-dense output tile
    x = x_ref[...]
    bt = x.shape[0]
    e = x.shape[2]
    f_pad = w_ref.shape[1]

    # im2col: k_eff shifted views concatenated along the lane axis.
    # NOTE: the j=1..k_eff-1 views are sub-8 sublane shifts (relayout copies);
    # acceptable here since XLU slots are otherwise idle and VMEM is ample.
    cols = jnp.concatenate(
        [x[:, j:j + l_out, :] for j in range(k_eff)], axis=-1)  # (bt, l_out, k_eff*E)
    lhs = cols.reshape(bt * l_out, k_eff * e)

    # One MXU matmul covering every branch and every tap (K % 128 == 0).
    acc = jnp.dot(lhs, w_ref[...], preferred_element_type=jnp.float32)
    acc = acc.reshape(bt, l_out, f_pad)

    # Robust validity select (instead of additive -1e30): column f is valid
    # for time t < lvalid[f].
    t_iota = lax.broadcasted_iota(jnp.int32, (l_out, f_pad), 0)
    valid = t_iota < lvalid_ref[...]                            # (l_out, f_pad)
    acc = jnp.where(valid[None, :, :], acc, jnp.finfo(jnp.float32).min)

    mx = jnp.max(acc, axis=1)                                   # (bt, f_pad)

    # Bias + ReLU hoisted past the max: max_l ReLU(a_l + b) == ReLU(max_l a_l + b).
    o_ref[...] = jnp.maximum(mx + b_ref[...], 0.0)


def _is_dual_core_chip():
    # v7x has 2 TensorCores per chip; v5e/v6e have 1. Fallback: single-core.
    try:
        kind = jax.devices()[0].device_kind.lower()
    except Exception:
        return False
    return ("v7" in kind) or ("7x" in kind)


def _choose_batch_tile(B, per_sample_bytes, vmem_budget_bytes, prefer_multi_step):
    divisors = [d for d in range(B, 0, -1) if B % d == 0]
    # second-to-last out dim must be a multiple of 8 or equal the full dim
    ok = [d for d in divisors if d == B or d % 8 == 0] or [B]
    fitting = [d for d in ok if d * per_sample_bytes <= vmem_budget_bytes] or [min(ok)]
    if prefer_multi_step:
        even = [d for d in fitting if (B // d) >= 2 and (B // d) % 2 == 0]
        if even:
            return even[0]
        multi = [d for d in fitting if (B // d) >= 2]
        if multi:
            return multi[0]
    return fitting[0]


def textcnn_forward(x, weights, biases, kernel_sizes, *, batch_tile=None,
                    use_bf16=False):
    """Fused TextCNN forward.

    x:        (B, L, E) float32
    weights:  list of (k, E, F) float32  (PyTorch Conv1d weight (F, E, k), transposed)
    biases:   list of (F,) float32
    returns:  (B, F * len(kernel_sizes)) float32
    """
    B, L, E = x.shape
    kmax = max(kernel_sizes)
    kmin = min(kernel_sizes)
    assert L >= kmax, "sequence shorter than the largest kernel size"
    F = weights[0].shape[2]
    f_tot = F * len(kernel_sizes)

    # Lane-dense packed filter dim (>= 128, multiple of 128).
    F_PAD = max(128, ((f_tot + 127) // 128) * 128)

    # Pad the contraction dim to a multiple of 128 with extra zero-weight taps.
    step = 128 // math.gcd(E, 128)
    k_eff = ((kmax + step - 1) // step) * step
    K = k_eff * E
    assert K % 128 == 0

    # Valid output positions padded to a multiple of 8 (clean sublane merge for
    # the (bt, l_out, K) -> (bt*l_out, K) reshape); extra positions masked.
    l_out = ((L - kmin + 1) + 7) // 8 * 8
    l_pad = max(L, l_out + k_eff - 1)
    x_pad = jnp.pad(x, ((0, 0), (0, l_pad - L), (0, 0))) if l_pad > L else x

    # Pack all branches into one im2col weight matrix; taps j >= k and
    # columns f >= f_tot are zero, so they contribute nothing.
    w_packed = jnp.zeros((k_eff, E, F_PAD), jnp.float32)
    for bidx, (w, k) in enumerate(zip(weights, kernel_sizes)):
        w_packed = w_packed.at[:k, :, bidx * F:(bidx + 1) * F].set(
            w.astype(jnp.float32))
    w_packed = w_packed.reshape(K, F_PAD)

    b_packed = jnp.zeros((1, F_PAD), jnp.float32)
    b_packed = b_packed.at[0, :f_tot].set(
        jnp.concatenate([b.astype(jnp.float32) for b in biases]))

    # Per-column valid time length (padded columns: 1 valid position -> finite max).
    lvalid = jnp.ones((F_PAD,), jnp.int32)
    lvalid = lvalid.at[:f_tot].set(jnp.concatenate(
        [jnp.full((F,), L - k + 1, jnp.int32) for k in kernel_sizes]))
    lvalid = lvalid.reshape(1, F_PAD)

    in_dtype = jnp.bfloat16 if use_bf16 else jnp.float32
    if use_bf16:
        # NOTE: small numeric delta vs. exact-f32 PyTorch; accumulation stays f32.
        x_pad = x_pad.astype(jnp.bfloat16)
        w_packed = w_packed.astype(jnp.bfloat16)
    in_isz = jnp.dtype(in_dtype).itemsize

    # Per-grid-step VMEM working set estimate (bytes per batch row).
    per_sample_bytes = (2 * l_pad * E * in_isz        # double-buffered x tile
                        + l_out * K * in_isz          # im2col cols temporary
                        + l_out * F_PAD * 4           # f32 matmul accumulator
                        + 2 * F_PAD * 4)              # double-buffered output row
    resident_bytes = K * F_PAD * in_isz + 2 * F_PAD * 4 + 2 * F_PAD * 4
    budget = 40 * 1024 * 1024                          # safe inside v7x's 64 MiB

    dual_core = _is_dual_core_chip()
    if batch_tile is None:
        bt = _choose_batch_tile(B, per_sample_bytes,
                                budget - resident_bytes, dual_core)
    else:
        bt = batch_tile
        assert B % bt == 0 and (bt == B or bt % 8 == 0)
    grid = (B // bt,)

    vmem_limit = int(min(64 * 1024 * 1024,
                         max(32 * 1024 * 1024,
                             2 * (bt * per_sample_bytes + resident_bytes))))

    kernel = functools.partial(_textcnn_fused_kernel, k_eff=k_eff, l_out=l_out)
    out = pl.pallas_call(
        kernel,
        out_shape=jax.ShapeDtypeStruct((B, F_PAD), jnp.float32),
        grid=grid,
        in_specs=[
            pl.BlockSpec((bt, l_pad, E), lambda i: (i, 0, 0)),
            pl.BlockSpec((K, F_PAD), lambda i: (0, 0)),
            pl.BlockSpec((1, F_PAD), lambda i: (0, 0)),
            pl.BlockSpec((1, F_PAD), lambda i: (0, 0)),
        ],
        out_specs=pl.BlockSpec((bt, F_PAD), lambda i: (i, 0)),
        compiler_params=pltpu.CompilerParams(
            dimension_semantics=("parallel",),
            vmem_limit_bytes=vmem_limit),
    )(x_pad, w_packed, b_packed, lvalid)

    return out[:, :f_tot]


def _reference_forward(x, weights, biases, kernel_sizes):
    # Pure-JAX reference mirroring the PyTorch module.
    B, L, E = x.shape
    outs = []
    for w, b, k in zip(weights, biases, kernel_sizes):
        L_out = L - k + 1
        acc = jnp.zeros((B, L_out, w.shape[2]), jnp.float32)
        for j in range(k):
            acc = acc + jnp.einsum("ble,ef->blf", x[:, j:j + L_out, :], w[j])
        acc = jnp.maximum(acc + b[None, None, :], 0.0)
        outs.append(jnp.max(acc, axis=1))
    return jnp.concatenate(outs, axis=1)


if __name__ == "__main__":
    # Small shapes consistent with the module's forward:
    #   x: (batch, seq_len, embedding_dim)
    batch, seq_len, embedding_dim = 16, 16, 32
    num_filters = 16
    kernel_sizes = [2, 3, 4]

    key = jax.random.PRNGKey(0)
    kx, *kws = jax.random.split(key, 1 + 2 * len(kernel_sizes))

    x = jax.random.normal(kx, (batch, seq_len, embedding_dim), jnp.float32)

    weights, biases = [], []
    for i, k in enumerate(kernel_sizes):
        # shapes match nn.Conv1d(E, F, k): torch weight (F, E, k) stored as (k, E, F)
        w = 0.05 * jax.random.normal(
            kws[2 * i], (k, embedding_dim, num_filters), jnp.float32)
        b = 0.01 * jax.random.normal(
            kws[2 * i + 1], (num_filters,), jnp.float32)
        weights.append(w)
        biases.append(b)

    out = textcnn_forward(x, weights, biases, kernel_sizes)
    out = jax.block_until_ready(out)

    ref = _reference_forward(x, weights, biases, kernel_sizes)
    assert out.shape == (batch, num_filters * len(kernel_sizes))
    assert jnp.allclose(out, ref, atol=1e-4, rtol=1e-4)

    print("KERNEL_OK")
</pallas_src>

<mosaic_0001>
module attributes {stable_mosaic.version = 11 : i64} {
  func.func @_textcnn_fused_kernel(%arg0: i32, %arg1: memref<16x19x32xf32, #tpu.memory_space<vmem>>, %arg2: memref<128x128xf32, #tpu.memory_space<vmem>>, %arg3: memref<1x128xf32, #tpu.memory_space<vmem>>, %arg4: memref<1x128xi32, #tpu.memory_space<vmem>>, %arg5: memref<16x128xf32, #tpu.memory_space<vmem>>) attributes {dimension_semantics = [#tpu.dimension_semantics<parallel>], iteration_bounds = array<i64: 1>, scalar_prefetch = 0 : i64, scratch_operands = 0 : i64, tpu.core_type = #tpu.core_type<tc>, window_params = [{transform_indices = @transform_0, window_bounds = array<i64: 16, 19, 32>}, {pipeline_mode = #tpu.pipeline_mode<synchronous>, transform_indices = @transform_1, window_bounds = array<i64: 128, 128>}, {pipeline_mode = #tpu.pipeline_mode<synchronous>, transform_indices = @transform_2, window_bounds = array<i64: 1, 128>}, {pipeline_mode = #tpu.pipeline_mode<synchronous>, transform_indices = @transform_3, window_bounds = array<i64: 1, 128>}, {transform_indices = @transform_4, window_bounds = array<i64: 16, 128>}]} {
    %c0 = arith.constant 0 : index
    %c0_0 = arith.constant 0 : index
    %c0_1 = arith.constant 0 : index
    %0 = vector.load %arg1[%c0, %c0_0, %c0_1] : memref<16x19x32xf32, #tpu.memory_space<vmem>>, vector<16x19x32xf32>
    %1 = vector.extract_strided_slice %0 {offsets = [0, 0, 0], sizes = [16, 16, 32], strides = [1, 1, 1]} : vector<16x19x32xf32> to vector<16x16x32xf32>
    %2 = vector.extract_strided_slice %0 {offsets = [0, 1, 0], sizes = [16, 16, 32], strides = [1, 1, 1]} : vector<16x19x32xf32> to vector<16x16x32xf32>
    %3 = vector.extract_strided_slice %0 {offsets = [0, 2, 0], sizes = [16, 16, 32], strides = [1, 1, 1]} : vector<16x19x32xf32> to vector<16x16x32xf32>
    %4 = vector.extract_strided_slice %0 {offsets = [0, 3, 0], sizes = [16, 16, 32], strides = [1, 1, 1]} : vector<16x19x32xf32> to vector<16x16x32xf32>
    %5 = tpu.concatenate %1, %2, %3, %4 in 2 : vector<16x16x32xf32>, vector<16x16x32xf32>, vector<16x16x32xf32>, vector<16x16x32xf32> -> vector<16x16x128xf32>
    %6 = vector.shape_cast %5 : vector<16x16x128xf32> to vector<256x128xf32>
    %c0_2 = arith.constant 0 : index
    %c0_3 = arith.constant 0 : index
    %7 = vector.load %arg2[%c0_2, %c0_3] : memref<128x128xf32, #tpu.memory_space<vmem>>, vector<128x128xf32>
    %cst = arith.constant dense<0.000000e+00> : vector<256x128xf32>
    %8 = tpu.matmul %6, %7, %cst {dimension_numbers = #tpu.dot_dimension_numbers<[1], [0], [0], [1], [0, 0, 1, 1], [], []>} : vector<256x128xf32>, vector<128x128xf32>, vector<256x128xf32> -> vector<256x128xf32>
    %9 = vector.shape_cast %8 : vector<256x128xf32> to vector<16x16x128xf32>
    %10 = tpu.iota {dimensions = array<i32: 0>} : vector<16x128xi32>
    %c0_4 = arith.constant 0 : index
    %c0_5 = arith.constant 0 : index
    %11 = vector.load %arg4[%c0_4, %c0_5] : memref<1x128xi32, #tpu.memory_space<vmem>>, vector<1x128xi32>
    %12 = vector.broadcast %11 : vector<1x128xi32> to vector<16x128xi32>
    %13 = arith.cmpi slt, %10, %12 : vector<16x128xi32>
    %14 = vector.shape_cast %13 : vector<16x128xi1> to vector<1x16x128xi1>
    %cst_6 = arith.constant -3.40282347E+38 : f32
    %15 = vector.shape_cast %14 : vector<1x16x128xi1> to vector<1x16x128xi1>
    %16 = vector.broadcast %15 : vector<1x16x128xi1> to vector<16x16x128xi1>
    %17 = vector.broadcast %cst_6 : f32 to vector<16x16x128xf32>
    %18 = arith.select %16, %9, %17 : vector<16x16x128xi1>, vector<16x16x128xf32>
    %cst_7 = arith.constant dense<0xFF800000> : vector<16x128xf32>
    %19 = vector.multi_reduction <maximumf>, %18, %cst_7 [1] : vector<16x16x128xf32> to vector<16x128xf32>
    %c0_8 = arith.constant 0 : index
    %c0_9 = arith.constant 0 : index
    %20 = vector.load %arg3[%c0_8, %c0_9] : memref<1x128xf32, #tpu.memory_space<vmem>>, vector<1x128xf32>
    %21 = vector.broadcast %20 : vector<1x128xf32> to vector<16x128xf32>
    %22 = arith.addf %19, %21 : vector<16x128xf32>
    %cst_10 = arith.constant 0.000000e+00 : f32
    %23 = vector.broadcast %cst_10 : f32 to vector<16x128xf32>
    %24 = arith.maximumf %22, %23 : vector<16x128xf32>
    %c0_11 = arith.constant 0 : index
    %c0_12 = arith.constant 0 : index
    %25 = vector.load %arg5[%c0_11, %c0_12] : memref<16x128xf32, #tpu.memory_space<vmem>>, vector<16x128xf32>
    tpu.vector_store %arg5[%c0_11, %c0_12], %24 {strides = array<i32>} : memref<16x128xf32, #tpu.memory_space<vmem>>, vector<16x128xf32>,
    return
  }
  func.func @transform_0(%arg0: i32) -> (i32, i32, i32) {
    %c0_i32 = arith.constant 0 : i32
    %c0_i32_0 = arith.constant 0 : i32
    %c0_i32_1 = arith.constant 0 : i32
    return %arg0, %c0_i32, %c0_i32_0 : i32, i32, i32
  }
  func.func @transform_1(%arg0: i32) -> (i32, i32) {
    %c0_i32 = arith.constant 0 : i32
    %c0_i32_0 = arith.constant 0 : i32
    %c0_i32_1 = arith.constant 0 : i32
    return %c0_i32, %c0_i32_0 : i32, i32
  }
  func.func @transform_2(%arg0: i32) -> (i32, i32) {
    %c0_i32 = arith.constant 0 : i32
    %c0_i32_0 = arith.constant 0 : i32
    %c0_i32_1 = arith.constant 0 : i32
    return %c0_i32, %c0_i32_0 : i32, i32
  }
  func.func @transform_3(%arg0: i32) -> (i32, i32) {
    %c0_i32 = arith.constant 0 : i32
    %c0_i32_0 = arith.constant 0 : i32
    %c0_i32_1 = arith.constant 0 : i32
    return %c0_i32, %c0_i32_0 : i32, i32
  }
  func.func @transform_4(%arg0: i32) -> (i32, i32) {
    %c0_i32 = arith.constant 0 : i32
    %c0_i32_0 = arith.constant 0 : i32
    return %arg0, %c0_i32 : i32, i32
  }
}

</mosaic_0001>

<bundles_post_ra>
// kernel: tpu_custom_call.1
= control target key start
LH: loop header
LB: loop body
LE: loop exit
PB: predicated region body
PF: predicated region fallthrough
CT: control target
= control target key end

     0   :  { %vm291_vm0 = vcmask 1045504   ;;  %vm114_vm1 = vcmask 1046528   ;;  %vm468_vm2 = vcmask 1044480   ;;  %s1701_s5 = smov 64   ;;  %s1702_s6 = smov 32   ;;  %s2509_s0 = inlined_call_operand.vmem [shape: f32[16,19,32], index: 0, kind: input, shape index: {}]   ;;  %s2510_s1 = inlined_call_operand.vmem [shape: f32[128,128], index: 1, kind: input, shape index: {}]   ;;  %s2511_s2 = inlined_call_operand.vmem [shape: f32[1,128], index: 2, kind: input, shape index: {}]   ;;  %s2512_s3 = inlined_call_operand.vmem [shape: s32[1,128], index: 3, kind: input, shape index: {}]   ;;  %s2513_s4 = inlined_call_operand.hbm [shape: f32[16,128], index: 4, kind: output, shape index: {}]  }
   0x1   :  { %v1735_v0 = vld [vmem:[%s2509_s0] sm:$0xff]  ;;  %v1740_v1 = vld [vmem:[%s2509_s0 + $0x8] sm:$0xff]  ;;  %v20_v12 = vld [vmem:[%s2509_s0 + $0x10] sm:$0x7]  ;;  %s1703_s17 = smov 96  }
   0x2   :  { %v1745_v2 = vld [vmem:[%s2509_s0 + $0xc0] sm:$0xff]  ;;  %v1750_v3 = vld [vmem:[%s2509_s0 + $0xc8] sm:$0xff]  ;;  %v292_v4 = vrot.slane %v1735_v0, 2  ;;  %v293_v5 = vrot.slane %v1740_v1, 2  ;;  %v115_v7 = vrot.slane %v1735_v0, 1  ;;  %v116_v9 = vrot.slane %v1740_v1, 1 }
   0x3   :  { %v332_v6 = vrot.slane %v1745_v2, 2  ;;  %v333_v8 = vrot.slane %v1750_v3, 2  ;;  %v155_v10 = vrot.slane %v1745_v2, 1  ;;  %v156_v11 = vrot.slane %v1750_v3, 1  ;;  %v44_v14 = vld [vmem:[%s2509_s0 + $0xd0] sm:$0x7] }
   0x4   :  { %v294_v13 = vsel %vm291_vm0, %v292_v4, %v293_v5  ;;  %v295_v15 = vrot.slane %v20_v12, 2  ;;  %v118_v16 = vrot.slane %v20_v12, 1  ;;  %v117_v18 = vsel %vm114_vm1, %v115_v7, %v116_v9  ;;  %v1775_v25 = vld [vmem:[%s2509_s0 + $0x20] sm:$0xff]  ;;  %v1782_v30 = vld [vmem:[%s2509_s0 + $0x28] sm:$0x7]  ;;  %v1803_v41 = vld [vmem:[%s2509_s0 + $0x18] sm:$0xff] }
   0x5   :  { %v334_v17 = vsel %vm291_vm0, %v332_v6, %v333_v8  ;;  %v157_v19 = vsel %vm114_vm1, %v155_v10, %v156_v11  ;;  %v335_v20 = vrot.slane %v44_v14, 2  ;;  %v158_v27 = vrot.slane %v44_v14, 1  ;;  %v1791_v35 = vld [vmem:[%s2509_s0 + $0xe0] sm:$0xff]  ;;  %v47_v36 = vld [vmem:[%s2509_s0 + $0xe8] sm:$0x7]  ;;  %v1808_v42 = vld [vmem:[%s2509_s0 + $0xd8] sm:$0xff] }
   0x6   :  { %v1447_v21 = vpack.i.bf16 %v334_v17, %v294_v13  ;;  %v1437_v22 = vpack.i.bf16 %v157_v19, %v117_v18  ;;  %v296_v23 = vsel %vm291_vm0, %v293_v5, %v295_v15  ;;  %v119_v24 = vsel %vm114_vm1, %v116_v9, %v118_v16  ;;  %v1832_v7 = vld [vmem:[%s2509_s0 + $0x38] sm:$0xff]  ;;  %v1855_v17 = vld [vmem:[%s2509_s0 + $0x100] sm:$0x7] }
   0x7   :  { %v336_v26 = vsel %vm291_vm0, %v333_v8, %v335_v20  ;;  %v470_v28 = vrot.slane %v1740_v1, 3  ;;  %v472_v29 = vrot.slane %v20_v12, 3  ;;  %v510_v32 = vrot.slane %v1750_v3, 3  ;;  %v1843_v12 = vld [vmem:[%s2509_s0 + $0x40] sm:$0x7]  ;;  %v1848_v13 = vld [vmem:[%s2509_s0 + $0xf8] sm:$0xff] }
   0x8   :  { %1448 = vrot.lane.b32.xlu1 %v1447_v21, %s1701_s5  ;;  %1438 = vrot.lane.b32.xlu0 %v1437_v22, %s1702_s6  ;;  %v1452_v31 = vpack.i.bf16 %v336_v26, %v296_v23  ;;  %v512_v33 = vrot.slane %v44_v14, 3  ;;  %v469_v34 = vrot.slane %v1735_v0, 3  ;;  %v159_v37 = vsel %vm114_vm1, %v156_v11, %v158_v27  ;;  %v1862_v20 = vld [vmem:[%s2509_s0 + $0x30] sm:$0xff] }
   0x9   :  { %v473_v38 = vsel %vm468_vm2, %v470_v28, %v472_v29  ;;  %v509_v39 = vrot.slane %v1745_v2, 3  ;;  %v121_v40 = vrot.slane %v1775_v25, 1  ;;  %v1442_v43 = vpack.i.bf16 %v159_v37, %v119_v24  ;;  %v1867_v21 = vld [vmem:[%s2509_s0 + $0xf0] sm:$0xff] }
   0xa   :  { %v513_v44 = vsel %vm468_vm2, %v510_v32, %v512_v33  ;;  %v471_v45 = vsel %vm468_vm2, %v469_v34, %v470_v28  ;;  %v123_v46 = vrot.slane %v1782_v30, 1  ;;  %v161_v49 = vrot.slane %v1791_v35, 1 }
   0xb   :  { %v1462_v47 = vpack.i.bf16 %v513_v44, %v473_v38  ;;  %v511_v48 = vsel %vm468_vm2, %v509_v39, %v510_v32  ;;  %v163_v50 = vrot.slane %v47_v36, 1  ;;  %v120_v53 = vrot.slane %v1803_v41, 1 }
   0xc   :  { %1453 = vrot.lane.b32.xlu1 %v1452_v31, %s1701_s5  ;;  %1443 = vrot.lane.b32.xlu0 %v1442_v43, %s1702_s6  ;;  %v1457_v51 = vpack.i.bf16 %v511_v48, %v471_v45  ;;  %v124_v52 = vsel %vm114_vm1, %v121_v40, %v123_v46  ;;  %v160_v54 = vrot.slane %v1808_v42, 1  ;;  %v298_v56 = vrot.slane %v1775_v25, 2 }
   0xd   :  { %v164_v55 = vsel %vm114_vm1, %v161_v49, %v163_v50  ;;  %v300_v57 = vrot.slane %v1782_v30, 2  ;;  %v338_v58 = vrot.slane %v1791_v35, 2  ;;  %v122_v60 = vsel %vm114_vm1, %v120_v53, %v121_v40  ;;  %v1896_v50 = vld [vmem:[%s2509_s0 + $0x50] sm:$0xff] }
   0xe   :  { %v1472_v59 = vpack.i.bf16 %v164_v55, %v124_v52  ;;  %v162_v61 = vsel %vm114_vm1, %v160_v54, %v161_v49  ;;  %v340_v62 = vrot.slane %v47_v36, 2  ;;  %v297_v5 = vrot.slane %v1803_v41, 2  ;;  %v1903_v55 = vld [vmem:[%s2509_s0 + $0x58] sm:$0x7] }
   0xf   :  { %v1467_v63 = vpack.i.bf16 %v162_v61, %v122_v60  ;;  %v301_v4 = vsel %vm291_vm0, %v298_v56, %v300_v57  ;;  %v337_v6 = vrot.slane %v1808_v42, 2  ;;  %v475_v9 = vrot.slane %v1775_v25, 3  ;;  %v1913_v57 = vld [vmem:[%s2509_s0 + $0x118] sm:$0x7] }
  0x10   :  { %1463 = vrot.lane.b32.xlu1 %v1462_v47, %s1703_s17  ;;  %1458 = vrot.lane.b32.xlu0 %v1457_v51, %s1703_s17  ;;  %v341_v8 = vsel %vm291_vm0, %v338_v58, %v340_v62  ;;  %v477_v10 = vrot.slane %v1782_v30, 3  ;;  %v515_v11 = vrot.slane %v1791_v35, 3  ;;  %v299_v14 = vsel %vm291_vm0, %v297_v5, %v298_v56  ;;  %v1908_v56 = vld [vmem:[%s2509_s0 + $0x110] sm:$0xff]  ;;  %v1922_v62 = vld [vmem:[%s2509_s0 + $0x48] sm:$0xff] }
  0x11   :  { %v339_v15 = vsel %vm291_vm0, %v337_v6, %v338_v58  ;;  %v517_v16 = vrot.slane %v47_v36, 3  ;;  %v474_v18 = vrot.slane %v1803_v41, 3  ;;  %v514_v19 = vrot.slane %v1808_v42, 3 }
  0x12   :  { %v1482_v22 = vpack.i.bf16 %v341_v8, %v301_v4  ;;  %v126_v23 = vrot.slane %v1832_v7, 1  ;;  %v128_v24 = vrot.slane %v1843_v12, 1  ;;  %v166_v26 = vrot.slane %v1848_v13, 1 }
  0x13   :  { %v1477_v27 = vpack.i.bf16 %v339_v15, %v299_v14  ;;  %v478_v28 = vsel %vm468_vm2, %v475_v9, %v477_v10  ;;  %v518_v29 = vsel %vm468_vm2, %v515_v11, %v517_v16  ;;  %v168_v30 = vrot.slane %v1855_v17, 1 }
  0x14   :  { %1473 = vrot.lane.b32.xlu1 %v1472_v59, %s1702_s6  ;;  %1468 = vrot.lane.b32.xlu0 %v1467_v63, %s1702_s6  ;;  %v476_v31 = vsel %vm468_vm2, %v474_v18, %v475_v9  ;;  %v516_v32 = vsel %vm468_vm2, %v514_v19, %v515_v11  ;;  %v125_v33 = vrot.slane %v1862_v20, 1  ;;  %v165_v34 = vrot.slane %v1867_v21, 1 }
  0x15   :  { %v129_v36 = vsel %vm114_vm1, %v126_v23, %v128_v24  ;;  %v303_v37 = vrot.slane %v1832_v7, 2  ;;  %v305_v38 = vrot.slane %v1843_v12, 2  ;;  %v343_v39 = vrot.slane %v1848_v13, 2 }
  0x16   :  { %v169_v40 = vsel %vm114_vm1, %v166_v26, %v168_v30  ;;  %v127_v43 = vsel %vm114_vm1, %v125_v33, %v126_v23  ;;  %v167_v44 = vsel %vm114_vm1, %v165_v34, %v166_v26  ;;  %v345_v45 = vrot.slane %v1855_v17, 2 }
  0x17   :  { %v1492_v46 = vpack.i.bf16 %v518_v29, %v478_v28  ;;  %v1487_v47 = vpack.i.bf16 %v516_v32, %v476_v31  ;;  %v302_v48 = vrot.slane %v1862_v20, 2  ;;  %v342_v49 = vrot.slane %v1867_v21, 2 }
  0x18   :  { %1483 = vrot.lane.b32.xlu1 %v1482_v22, %s1701_s5  ;;  %1478 = vrot.lane.b32.xlu0 %v1477_v27, %s1701_s5  ;;  %v1502_v51 = vpack.i.bf16 %v169_v40, %v129_v36  ;;  %v1497_v52 = vpack.i.bf16 %v167_v44, %v127_v43  ;;  %v306_v53 = vsel %vm291_vm0, %v303_v37, %v305_v38  ;;  %v480_v59 = vrot.slane %v1832_v7, 3 }
  0x19   :  { %v346_v54 = vsel %vm291_vm0, %v343_v39, %v345_v45  ;;  %v304_v58 = vsel %vm291_vm0, %v302_v48, %v303_v37  ;;  %v482_v60 = vrot.slane %v1843_v12, 3  ;;  %v520_v61 = vrot.slane %v1848_v13, 3 }
  0x1a   :  { %9 = vsyncpa [#allocation3], 0  ;;  %v344_v63 = vsel %vm291_vm0, %v342_v49, %v343_v39  ;;  %v522_v4 = vrot.slane %v1855_v17, 3  ;;  %v479_v5 = vrot.slane %v1862_v20, 3  ;;  %v519_v6 = vrot.slane %v1867_v21, 3  ;;  %v1933_v8 = vld [vmem:[%s2509_s0 + $0x108] sm:$0xff] }
  0x1b   :  { %v131_v9 = vrot.slane %v1896_v50, 1  ;;  %v133_v10 = vrot.slane %v1903_v55, 1  ;;  %v171_v11 = vrot.slane %v1908_v56, 1  ;;  %v173_v12 = vrot.slane %v1913_v57, 1  ;;  %v1968_v48 = vld [vmem:[%s2509_s0 + $0x68] sm:$0xff] }
  0x1c   :  { %1493 = vrot.lane.b32.xlu1 %v1492_v46, %s1703_s17  ;;  %1488 = vrot.lane.b32.xlu0 %v1487_v47, %s1703_s17  ;;  %v130_v14 = vrot.slane %v1922_v62, 1  ;;  %v1512_v15 = vpack.i.bf16 %v346_v54, %v306_v53  ;;  %v170_v16 = vrot.slane %v1933_v8, 1  ;;  %v1507_v17 = vpack.i.bf16 %v344_v63, %v304_v58  ;;  %v32_v49 = vld [vmem:[%s2509_s0 + $0x70] sm:$0x7] }
  0x1d   :  { %v483_v18 = vsel %vm468_vm2, %v480_v59, %v482_v60  ;;  %v523_v19 = vsel %vm468_vm2, %v520_v61, %v522_v4  ;;  %v481_v22 = vsel %vm468_vm2, %v479_v5, %v480_v59  ;;  %v521_v23 = vsel %vm468_vm2, %v519_v6, %v520_v61  ;;  %v56_v58 = vld [vmem:[%s2509_s0 + $0x130] sm:$0x7]  ;;  %v1990_v59 = vld [vmem:[%s2509_s0 + $0x60] sm:$0xff] }
  0x1e   :  { %v134_v24 = vsel %vm114_vm1, %v131_v9, %v133_v10  ;;  %v174_v26 = vsel %vm114_vm1, %v171_v11, %v173_v12  ;;  %v132_v27 = vsel %vm114_vm1, %v130_v14, %v131_v9  ;;  %v308_v28 = vrot.slane %v1896_v50, 2 }
  0x1f   :  { %v310_v29 = vrot.slane %v1903_v55, 2  ;;  %v348_v30 = vrot.slane %v1908_v56, 2  ;;  %v172_v31 = vsel %vm114_vm1, %v170_v16, %v171_v11  ;;  %v350_v32 = vrot.slane %v1913_v57, 2 }
  0x20   :  { %1503 = vrot.lane.b32.xlu1 %v1502_v51, %s1702_s6  ;;  %1498 = vrot.lane.b32.xlu0 %v1497_v52, %s1702_s6  ;;  %v307_v33 = vrot.slane %v1922_v62, 2  ;;  %v347_v34 = vrot.slane %v1933_v8, 2  ;;  %v1522_v36 = vpack.i.bf16 %v523_v19, %v483_v18  ;;  %v1517_v37 = vpack.i.bf16 %v521_v23, %v481_v22  ;;  %v1976_v51 = vld [vmem:[%s2509_s0 + $0x128] sm:$0xff] }
  0x21   :  { %v1532_v38 = vpack.i.bf16 %v174_v26, %v134_v24  ;;  %v1527_v39 = vpack.i.bf16 %v172_v31, %v132_v27  ;;  %v485_v40 = vrot.slane %v1896_v50, 3  ;;  %v487_v43 = vrot.slane %v1903_v55, 3 }
  0x22   :  { %v311_v44 = vsel %vm291_vm0, %v308_v28, %v310_v29  ;;  %v351_v45 = vsel %vm291_vm0, %v348_v30, %v350_v32  ;;  %v309_v46 = vsel %vm291_vm0, %v307_v33, %v308_v28  ;;  %v349_v47 = vsel %vm291_vm0, %v347_v34, %v348_v30 }
  0x23   :  { %v525_v52 = vrot.slane %v1908_v56, 3  ;;  %v527_v53 = vrot.slane %v1913_v57, 3  ;;  %v484_v54 = vrot.slane %v1922_v62, 3  ;;  %v524_v55 = vrot.slane %v1933_v8, 3  ;;  %v1996_v57 = vld [vmem:[%s2509_s0 + $0x120] sm:$0xff] }
  0x24   :  { %1513 = vrot.lane.b32.xlu1 %v1512_v15, %s1701_s5  ;;  %1508 = vrot.lane.b32.xlu0 %v1507_v17, %s1701_s5  ;;  %v1542_v60 = vpack.i.bf16 %v351_v45, %v311_v44  ;;  %v1537_v61 = vpack.i.bf16 %v349_v47, %v309_v46  ;;  %v488_v63 = vsel %vm468_vm2, %v485_v40, %v487_v43  ;;  %v136_v4 = vrot.slane %v1968_v48, 1  ;;  %v2034_v44 = vld [vmem:[%s2509_s0 + $0x140] sm:$0xff]  ;;  %v59_v45 = vld [vmem:[%s2509_s0 + $0x148] sm:$0x7] }
  0x25   :  { %v138_v5 = vrot.slane %v32_v49, 1  ;;  %v176_v6 = vrot.slane %v1976_v51, 1  ;;  %v178_v9 = vrot.slane %v56_v58, 1  ;;  %v528_v10 = vsel %vm468_vm2, %v525_v52, %v527_v53  ;;  %v2046_v53 = vld [vmem:[%s2509_s0 + $0x78] sm:$0xff] }
  0x26   :  { %v486_v11 = vsel %vm468_vm2, %v484_v54, %v485_v40  ;;  %v526_v12 = vsel %vm468_vm2, %v524_v55, %v525_v52  ;;  %v135_v14 = vrot.slane %v1990_v59, 1  ;;  %v175_v15 = vrot.slane %v1996_v57, 1  ;;  %v2051_v54 = vld [vmem:[%s2509_s0 + $0x138] sm:$0xff] }
  0x27   :  { %v1552_v16 = vpack.i.bf16 %v528_v10, %v488_v63  ;;  %v1547_v17 = vpack.i.bf16 %v526_v12, %v486_v11  ;;  %v139_v18 = vsel %vm114_vm1, %v136_v4, %v138_v5  ;;  %v179_v19 = vsel %vm114_vm1, %v176_v6, %v178_v9 }
  0x28   :  { %1523 = vrot.lane.b32.xlu1 %v1522_v36, %s1703_s17  ;;  %1518 = vrot.lane.b32.xlu0 %v1517_v37, %s1703_s17  ;;  %v137_v22 = vsel %vm114_vm1, %v135_v14, %v136_v4  ;;  %v313_v23 = vrot.slane %v1968_v48, 2  ;;  %v315_v24 = vrot.slane %v32_v49, 2  ;;  %v353_v26 = vrot.slane %v1976_v51, 2 }
  0x29   :  { %v177_v27 = vsel %vm114_vm1, %v175_v15, %v176_v6  ;;  %v355_v28 = vrot.slane %v56_v58, 2  ;;  %v312_v29 = vrot.slane %v1990_v59, 2  ;;  %v352_v30 = vrot.slane %v1996_v57, 2 }
  0x2a   :  { %v490_v31 = vrot.slane %v1968_v48, 3  ;;  %v492_v32 = vrot.slane %v32_v49, 3  ;;  %v530_v33 = vrot.slane %v1976_v51, 3  ;;  %v532_v34 = vrot.slane %v56_v58, 3 }
  0x2b   :  { %v489_v36 = vrot.slane %v1990_v59, 3  ;;  %v529_v37 = vrot.slane %v1996_v57, 3  ;;  %v1562_v40 = vpack.i.bf16 %v179_v19, %v139_v18  ;;  %v1557_v43 = vpack.i.bf16 %v177_v27, %v137_v22 }
  0x2c   :  { %1533 = vrot.lane.b32.xlu1 %v1532_v38, %s1702_s6  ;;  %1528 = vrot.lane.b32.xlu0 %v1527_v39, %s1702_s6  ;;  %v2024_v38 = vld [vmem:[%s2509_s0 + $0x80] sm:$0xff]  ;;  %v35_v39 = vld [vmem:[%s2509_s0 + $0x88] sm:$0x7]  ;;  %v316_v46 = vsel %vm291_vm0, %v313_v23, %v315_v24  ;;  %v356_v47 = vsel %vm291_vm0, %v353_v26, %v355_v28  ;;  %v314_v49 = vsel %vm291_vm0, %v312_v29, %v313_v23  ;;  %v181_v5 = vrot.slane %v2034_v44, 1 }
  0x2d   :  { %v354_v52 = vsel %vm291_vm0, %v352_v30, %v353_v26  ;;  %v493_v55 = vsel %vm468_vm2, %v490_v31, %v492_v32  ;;  %v533_v58 = vsel %vm468_vm2, %v530_v33, %v532_v34  ;;  %v491_v63 = vsel %vm468_vm2, %v489_v36, %v490_v31  ;;  %v2077_v31 = vld [vmem:[%s2509_s0 + $0x98] sm:$0xff]  ;;  %v2082_v32 = vld [vmem:[%s2509_s0 + $0xa0] sm:$0x7] }
  0x2e   :  { %v531_v4 = vsel %vm468_vm2, %v529_v37, %v530_v33  ;;  %v183_v6 = vrot.slane %v59_v45, 1  ;;  %v1572_v9 = vpack.i.bf16 %v356_v47, %v316_v46  ;;  %v1567_v10 = vpack.i.bf16 %v354_v52, %v314_v49  ;;  %v2087_v33 = vld [vmem:[%s2509_s0 + $0x158] sm:$0xff] }
  0x2f   :  { %v140_v11 = vrot.slane %v2046_v53, 1  ;;  %v180_v12 = vrot.slane %v2051_v54, 1  ;;  %v1582_v14 = vpack.i.bf16 %v533_v58, %v493_v55  ;;  %v1577_v15 = vpack.i.bf16 %v531_v4, %v491_v63 }
  0x30   :  { %1543 = vrot.lane.b32.xlu1 %v1542_v60, %s1701_s5  ;;  %1538 = vrot.lane.b32.xlu0 %v1537_v61, %s1701_s5  ;;  %v141_v60 = vrot.slane %v2024_v38, 1  ;;  %v143_v61 = vrot.slane %v35_v39, 1  ;;  %v318_v18 = vrot.slane %v2024_v38, 2  ;;  %v320_v19 = vrot.slane %v35_v39, 2 }
  0x31   :  { %v182_v23 = vsel %vm114_vm1, %v180_v12, %v181_v5  ;;  %v358_v24 = vrot.slane %v2034_v44, 2  ;;  %v360_v26 = vrot.slane %v59_v45, 2  ;;  %v317_v27 = vrot.slane %v2046_v53, 2 }
  0x32   :  { %v142_v22 = vsel %vm114_vm1, %v140_v11, %v141_v60  ;;  %v357_v28 = vrot.slane %v2051_v54, 2  ;;  %v495_v29 = vrot.slane %v2024_v38, 3  ;;  %v497_v30 = vrot.slane %v35_v39, 3 }
  0x33   :  { %v535_v34 = vrot.slane %v2034_v44, 3  ;;  %v537_v36 = vrot.slane %v59_v45, 3  ;;  %v494_v37 = vrot.slane %v2046_v53, 3  ;;  %v534_v39 = vrot.slane %v2051_v54, 3  ;;  %v2103_v45 = vld [vmem:[%s2509_s0 + $0x90] sm:$0xff] }
  0x34   :  { %1553 = vrot.lane.b32.xlu1 %v1552_v16, %s1703_s17  ;;  %1548 = vrot.lane.b32.xlu0 %v1547_v17, %s1703_s17  ;;  %v144_v16 = vsel %vm114_vm1, %v141_v60, %v143_v61  ;;  %v184_v17 = vsel %vm114_vm1, %v181_v5, %v183_v6  ;;  %v1587_v46 = vpack.i.bf16 %v182_v23, %v142_v22  ;;  %v2112_v60 = vld [vmem:[%s2509_s0 + $0x150] sm:$0xff]  ;;  %v146_v61 = vrot.slane %v2077_v31, 1  ;;  %v744_v22 = vld [vmem:[%s2510_s1] sm:$0xff] }
  0x35   :  { %v321_v47 = vsel %vm291_vm0, %v318_v18, %v320_v19  ;;  %v361_v49 = vsel %vm291_vm0, %v358_v24, %v360_v26  ;;  %v319_v52 = vsel %vm291_vm0, %v317_v27, %v318_v18  ;;  %v359_v55 = vsel %vm291_vm0, %v357_v28, %v358_v24  ;;  %v745_v23 = vld [vmem:[%s2510_s1 + $0x8] sm:$0xff] }
  0x36   :  { %v498_v58 = vsel %vm468_vm2, %v495_v29, %v497_v30  ;;  %v148_v63 = vrot.slane %v2082_v32, 1  ;;  %v186_v4 = vrot.slane %v2087_v33, 1  ;;  %v538_v6 = vsel %vm468_vm2, %v535_v34, %v537_v36  ;;  %v747_v30 = vld [vmem:[%s2510_s1 + $0x18] sm:$0xff] }
  0x37   :  { %v145_v11 = vrot.slane %v2103_v45, 1  ;;  %v1602_v12 = vpack.i.bf16 %v361_v49, %v321_v47  ;;  %v323_v26 = vrot.slane %v2077_v31, 2  ;;  %v325_v27 = vrot.slane %v2082_v32, 2 }
  0x38   :  { %1563 = vrot.lane.b32.xlu1 %v1562_v40, %s1702_s6  ;;  %1558 = vrot.lane.b32.xlu0 %v1557_v43, %s1702_s6  ;;  %v2095_v40 = vld [vmem:[%s2509_s0 + $0x160] sm:$0x7]  ;;  %v1592_v43 = vpack.i.bf16 %v184_v17, %v144_v16  ;;  %v1612_v16 = vpack.i.bf16 %v538_v6, %v498_v58  ;;  %v149_v18 = vsel %vm114_vm1, %v146_v61, %v148_v63  ;;  %v363_v28 = vrot.slane %v2087_v33, 2  ;;  %v2156_v58 = vld [vmem:[%s2509_s0 + $0xb0] sm:$0xff] }
  0x39   :  { %v188_v5 = vrot.slane %v2095_v40, 1  ;;  %v147_v24 = vsel %vm114_vm1, %v145_v11, %v146_v61  ;;  %v365_v36 = vrot.slane %v2095_v40, 2  ;;  %v1383_v47 = vpack.c.bf16 %v745_v23, %v744_v22 }
  0x3a   :  { %v539_v6 = vrot.slane %v2112_v60, 3  ;;  %v151_v22 = vrot.slane %v2156_v58, 1  ;;  %vm645_vm3 = vcmask 261120   ;;  %vm678_vm4 = vcmask 523264  }
  0x3b   :  { %v189_v19 = vsel %vm114_vm1, %v186_v4, %v188_v5  ;;  %v499_v5 = vrot.slane %v2103_v45, 3  ;;  %1384 = vmatprep.subr.bf16.mxu0 %v1383_v47  ;;  %1415 = vmatprep.subr.bf16.mxu1 %v1383_v47  ;;  %vm711_vm5 = vcmask 785408   ;;  %vm1199_vm8 = vcmask 1041409  }
  0x3c   :  { %1573 = vrot.lane.b32.xlu1 %v1572_v9, %s1701_s5  ;;  %1568 = vrot.lane.b32.xlu0 %v1567_v10, %s1701_s5  ;;  %v496_v9 = vsel %vm468_vm2, %v494_v37, %v495_v29  ;;  %v536_v10 = vsel %vm468_vm2, %v534_v39, %v535_v34  ;;  %v746_v29 = vld [vmem:[%s2510_s1 + $0x10] sm:$0xff]  ;;  %v322_v37 = vrot.slane %v2103_v45, 2  ;;  %v362_v39 = vrot.slane %v2112_v60, 2 }
  0x3d   :  { %v1607_v17 = vpack.i.bf16 %v536_v10, %v496_v9  ;;  %v1622_v49 = vpack.i.bf16 %v189_v19, %v149_v18  ;;  %v1387_v61 = vpack.c.bf16 %v747_v30, %v746_v29  ;;  %v749_v9 = vld [vmem:[%s2510_s1 + $0x28] sm:$0xff]  ;;  %v366_v10 = vsel %vm291_vm0, %v363_v28, %v365_v36  ;;  %v2186_v18 = vld [vmem:[%s2509_s0 + $0x178] sm:$0x7]  ;;  %1386 = vmatpush3.bf16.msra.mxu0 %v1383_v47  ;;  %v750_v30 = vld [vmem:[%s2510_s1 + $0x30] sm:$0xff] }
  0x3e   :  { %v324_v11 = vsel %vm291_vm0, %v322_v37, %v323_v26  ;;  %1423 = vmatpush3.bf16.msra.mxu1 %v1383_v47  ;;  %v193_v37 = vrot.slane %v2186_v18, 1  ;;  %vm1202_vm9 = vcmask 1042434   ;;  %vm1205_vm10 = vcmask 1043459  }
  0x3f   :  { %1388 = vmatprep.subr.bf16.mxu0 %v1387_v61  ;;  %1416 = vmatprep.subr.bf16.mxu1 %v1387_v61  ;;  %vm1208_vm11 = vcmask 1044484   ;;  %vm1211_vm12 = vcmask 1045509   ;;  %vm1214_vm13 = vcmask 1046534   ;;  %vm1217_vm14 = vcmask 1047559  }
  0x40   :  { %1583 = vrot.lane.b32.xlu1 %v1582_v14, %s1703_s17  ;;  %1578 = vrot.lane.b32.xlu0 %v1577_v15, %s1703_s17  ;;  %v1597_v14 = vpack.i.bf16 %v359_v55, %v319_v52  ;;  %v185_v15 = vrot.slane %v2112_v60, 1  ;;  %v540_v52 = vrot.slane %v2087_v33, 3  ;;  %v542_v55 = vrot.slane %v2095_v40, 3  ;;  %v748_v40 = vld [vmem:[%s2510_s1 + $0x20] sm:$0xff] }
  0x41   :  { %1390 = vmatpush3.bf16.msra.mxu0 %v1387_v61 }
  0x42   :  { %v187_v34 = vsel %vm114_vm1, %v185_v15, %v186_v4  ;;  %v326_v4 = vsel %vm291_vm0, %v323_v26, %v325_v27  ;;  %v543_v19 = vsel %vm468_vm2, %v540_v52, %v542_v55  ;;  %v541_v29 = vsel %vm468_vm2, %v539_v6, %v540_v52  ;;  %1424 = vmatpush3.bf16.msra.mxu1 %v1387_v61  ;;  %v752_v6 = vld [vmem:[%s2510_s1 + $0x40] sm:$0xff]  ;;  %v753_v61 = vld [vmem:[%s2510_s1 + $0x48] sm:$0xff] }
  0x43   :  { %v1617_v63 = vpack.i.bf16 %v187_v34, %v147_v24  ;;  %v1391_v24 = vpack.c.bf16 %v749_v9, %v748_v40  ;;  %v1632_v26 = vpack.i.bf16 %v366_v10, %v326_v4  ;;  %v751_v34 = vld [vmem:[%s2510_s1 + $0x38] sm:$0xff] }
  0x44   :  { %1593 = vrot.lane.b32.xlu1 %v1592_v43, %s1702_s6  ;;  %1588 = vrot.lane.b32.xlu0 %v1587_v46, %s1702_s6  ;;  %v500_v43 = vrot.slane %v2077_v31, 3  ;;  %v502_v46 = vrot.slane %v2082_v32, 3  ;;  %v2164_v32 = vld [vmem:[%s2509_s0 + $0xb8] sm:$0x7]  ;;  %v1395_v55 = vpack.c.bf16 %v751_v34, %v750_v30 }
  0x45   :  { %v153_v23 = vrot.slane %v2164_v32, 1  ;;  %1392 = vmatprep.subr.bf16.mxu0 %v1391_v24  ;;  %1417 = vmatprep.subr.bf16.mxu1 %v1391_v24  ;;  %v507_v30 = vrot.slane %v2164_v32, 3 }
  0x46   :  { %v503_v15 = vsel %vm468_vm2, %v500_v43, %v502_v46  ;;  %1394 = vmatpush3.bf16.msra.mxu0 %v1391_v24  ;;  %1425 = vmatpush3.bf16.msra.mxu1 %v1391_v24 }
  0x47   :  { %v1642_v46 = vpack.i.bf16 %v543_v19, %v503_v15  ;;  %v154_v52 = vsel %vm114_vm1, %v151_v22, %v153_v23  ;;  %1396 = vmatprep.subr.bf16.mxu0 %v1395_v55  ;;  %1418 = vmatprep.subr.bf16.mxu1 %v1395_v55  ;;  %v1399_v15 = vpack.c.bf16 %v753_v61, %v752_v6  ;;  %v758_v6 = vld [vmem:[%s2510_s1 + $0x70] sm:$0xff]  ;;  %v759_v61 = vld [vmem:[%s2510_s1 + $0x78] sm:$0xff] }
  0x48   :  { %1603 = vrot.lane.b32.xlu1 %v1602_v12, %s1701_s5  ;;  %1598 = vrot.lane.b32.xlu0 %v1597_v14, %s1701_s5  ;;  %v364_v12 = vsel %vm291_vm0, %v362_v39, %v363_v28  ;;  %v2180_v14 = vld [vmem:[%s2509_s0 + $0x170] sm:$0xff]  ;;  %v501_v28 = vsel %vm468_vm2, %v499_v5, %v500_v43  ;;  %v370_v5 = vrot.slane %v2186_v18, 2 }
  0x49   :  { %v1627_v27 = vpack.i.bf16 %v364_v12, %v324_v11  ;;  %v191_v36 = vrot.slane %v2180_v14, 1  ;;  %v1637_v47 = vpack.i.bf16 %v541_v29, %v501_v28  ;;  %v368_v4 = vrot.slane %v2180_v14, 2  ;;  %v755_v28 = vld [vmem:[%s2510_s1 + $0x58] sm:$0xff] }
  0x4a   :  { %v505_v29 = vrot.slane %v2156_v58, 3  ;;  %v545_v34 = vrot.slane %v2180_v14, 3  ;;  %1398 = vmatpush3.bf16.msra.mxu0 %v1395_v55  ;;  %1426 = vmatpush3.bf16.msra.mxu1 %v1395_v55 }
  0x4b   :  { %v194_v40 = vsel %vm114_vm1, %v191_v36, %v193_v37  ;;  %v547_v37 = vrot.slane %v2186_v18, 3  ;;  %1400 = vmatprep.subr.bf16.mxu0 %v1399_v15  ;;  %1419 = vmatprep.subr.bf16.mxu1 %v1399_v15 }
  0x4c   :  { %1613 = vrot.lane.b32.xlu1 %v1612_v16, %s1703_s17  ;;  %1608 = vrot.lane.b32.xlu0 %v1607_v17, %s1703_s17  ;;  %v2191_v16 = vld [vmem:[%s2509_s0 + $0xa8] sm:$0xff]  ;;  %v1652_v19 = vpack.i.bf16 %v194_v40, %v154_v52 }
  0x4d   :  { %v2196_v17 = vld [vmem:[%s2509_s0 + $0x168] sm:$0xff]  ;;  %v150_v39 = vrot.slane %v2191_v16, 1  ;;  %v327_v11 = vrot.slane %v2191_v16, 2  ;;  %v548_v55 = vsel %vm468_vm2, %v545_v34, %v547_v37 }
  0x4e   :  { %v190_v43 = vrot.slane %v2196_v17, 1  ;;  %v367_v12 = vrot.slane %v2196_v17, 2  ;;  %1402 = vmatpush3.bf16.msra.mxu0 %v1399_v15  ;;  %1427 = vmatpush3.bf16.msra.mxu1 %v1399_v15 }
  0x4f   :  { %v152_v9 = vsel %vm114_vm1, %v150_v39, %v151_v22  ;;  %v754_v22 = vld [vmem:[%s2510_s1 + $0x50] sm:$0xff]  ;;  %v504_v39 = vrot.slane %v2191_v16, 3 }
  0x50   :  { %1623 = vrot.lane.b32.xlu1 %v1622_v49, %s1702_s6  ;;  %1618 = vrot.lane.b32.xlu0 %v1617_v63, %s1702_s6  ;;  %v328_v49 = vrot.slane %v2156_v58, 2  ;;  %v330_v63 = vrot.slane %v2164_v32, 2  ;;  %v192_v10 = vsel %vm114_vm1, %v190_v43, %v191_v36  ;;  %v369_v36 = vsel %vm291_vm0, %v367_v12, %v368_v4  ;;  %v757_v32 = vld [vmem:[%s2510_s1 + $0x68] sm:$0xff] }
  0x51   :  { %v1647_v23 = vpack.i.bf16 %v192_v10, %v152_v9  ;;  %v544_v43 = vrot.slane %v2196_v17, 3  ;;  %v1411_v10 = vpack.c.bf16 %v759_v61, %v758_v6 }
  0x52   :  { %v329_v24 = vsel %vm291_vm0, %v327_v11, %v328_v49 }
  0x53   :  { %v1657_v52 = vpack.i.bf16 %v369_v36, %v329_v24 }
  0x54   :  { %1633 = vrot.lane.b32.xlu1 %v1632_v26, %s1701_s5  ;;  %1628 = vrot.lane.b32.xlu0 %v1627_v27, %s1701_s5  ;;  %v331_v26 = vsel %vm291_vm0, %v328_v49, %v330_v63  ;;  %v371_v27 = vsel %vm291_vm0, %v368_v4, %v370_v5  ;;  %v508_v49 = vsel %vm468_vm2, %v505_v29, %v507_v30 }
  0x55   :  { %v1662_v18 = vpack.i.bf16 %v371_v27, %v331_v26  ;;  %v506_v63 = vsel %vm468_vm2, %v504_v39, %v505_v29  ;;  %v546_v4 = vsel %vm468_vm2, %v544_v43, %v545_v34  ;;  %v1672_v40 = vpack.i.bf16 %v548_v55, %v508_v49 }
  0x56   :  { %v1667_v9 = vpack.i.bf16 %v546_v4, %v506_v63 }
  0x58   :  { %1643 = vrot.lane.b32.xlu1 %v1642_v46, %s1703_s17  ;;  %1638 = vrot.lane.b32.xlu0 %v1637_v47, %s1703_s17  ;;  %v1403_v46 = vpack.c.bf16 %v755_v28, %v754_v22  ;;  %v756_v47 = vld [vmem:[%s2510_s1 + $0x60] sm:$0xff] }
  0x59   :  { %v1407_v5 = vpack.c.bf16 %v757_v32, %v756_v47 }
  0x5a   :  { %1404 = vmatprep.subr.bf16.mxu0 %v1403_v46  ;;  %1420 = vmatprep.subr.bf16.mxu1 %v1403_v46 }
  0x5b   :  { %1406 = vmatpush3.bf16.msra.mxu0 %v1403_v46  ;;  %1428 = vmatpush3.bf16.msra.mxu1 %v1403_v46 }
  0x5c   :  { %1653 = vrot.lane.b32.xlu1 %v1652_v19, %s1702_s6  ;;  %1648 = vrot.lane.b32.xlu0 %v1647_v23, %s1702_s6 }
  0x5d   :  { %1408 = vmatprep.subr.bf16.mxu0 %v1407_v5  ;;  %1421 = vmatprep.subr.bf16.mxu1 %v1407_v5 }
  0x5f   :  { %1410 = vmatpush3.bf16.msra.mxu0 %v1407_v5  ;;  %1429 = vmatpush3.bf16.msra.mxu1 %v1407_v5 }
  0x60   :  { %1663 = vrot.lane.b32.xlu1 %v1662_v18, %s1701_s5  ;;  %1658 = vrot.lane.b32.xlu0 %v1657_v52, %s1701_s5 }
  0x61   :  { %1412 = vmatprep.subr.bf16.mxu0 %v1411_v10  ;;  %1422 = vmatprep.subr.bf16.mxu1 %v1411_v10 }
  0x63   :  { %1414 = vmatpush3.bf16.msra.mxu0 %v1411_v10  ;;  %1430 = vmatpush3.bf16.msra.mxu1 %v1411_v10 }
  0x64   :  { %1673 = vrot.lane.b32.xlu1 %v1672_v40, %s1703_s17  ;;  %1668 = vrot.lane.b32.xlu0 %v1667_v9, %s1703_s17 }
  0x7a   :  { %v1449_v11 = vpop.permute.xlu1 %1448  ;;  %v1439_v12 = vpop.permute.xlu0 %1438 }
  0x7b   :  { %v1441_v15 = vunpack.i.h.bf16 %v1439_v12  ;;  %v1440_v19 = vunpack.i.l.bf16 %v1439_v12  ;;  %v1451_v28 = vunpack.i.h.bf16 %v1449_v11  ;;  %v1450_v24 = vunpack.i.l.bf16 %v1449_v11 }
  0x7d   :  { %v646_v34 = vsel %vm645_vm3, %v1735_v0, %v1440_v19  ;;  %v662_v36 = vsel %vm645_vm3, %v1745_v2, %v1441_v15 }
  0x7e   :  { %v1454_v23 = vpop.permute.xlu1 %1453  ;;  %v1444_v26 = vpop.permute.xlu0 %1443  ;;  %v679_v49 = vsel %vm678_vm4, %v646_v34, %v1450_v24  ;;  %v695_v0 = vsel %vm678_vm4, %v662_v36, %v1451_v28 }
  0x7f   :  { %v1446_v27 = vunpack.i.h.bf16 %v1444_v26  ;;  %v1445_v22 = vunpack.i.l.bf16 %v1444_v26  ;;  %v1456_v29 = vunpack.i.h.bf16 %v1454_v23  ;;  %v1455_v30 = vunpack.i.l.bf16 %v1454_v23 }
  0x81   :  { %v647_v37 = vsel %vm645_vm3, %v1740_v1, %v1445_v22  ;;  %v663_v39 = vsel %vm645_vm3, %v1750_v3, %v1446_v27 }
  0x82   :  { %v1464_v43 = vpop.permute.xlu1 %1463  ;;  %v1459_v46 = vpop.permute.xlu0 %1458  ;;  %v680_v55 = vsel %vm678_vm4, %v647_v37, %v1455_v30  ;;  %v696_v2 = vsel %vm678_vm4, %v663_v39, %v1456_v29 }
  0x83   :  { %v1466_v47 = vunpack.i.h.bf16 %v1464_v43  ;;  %v1465_v32 = vunpack.i.l.bf16 %v1464_v43  ;;  %v1461_v18 = vunpack.i.h.bf16 %v1459_v46  ;;  %v1460_v52 = vunpack.i.l.bf16 %v1459_v46 }
  0x85   :  { %v712_v1 = vsel %vm711_vm5, %v679_v49, %v1460_v52  ;;  %v728_v63 = vsel %vm711_vm5, %v695_v0, %v1461_v18  ;;  %v713_v3 = vsel %vm711_vm5, %v680_v55, %v1465_v32  ;;  %v729_v4 = vsel %vm711_vm5, %v696_v2, %v1466_v47 }
  0x86   :  { %v1474_v5 = vpop.permute.xlu1 %1473  ;;  %v1469_v6 = vpop.permute.xlu0 %1468  ;;  %1335 = vmatprep.mubr.f32.mxu0 %v712_v1  ;;  %1359 = vmatprep.mubr.f32.mxu1 %v728_v63 }
  0x87   :  { %1336 = vmatmul.mubr.f32.vlgmr.msra.gmra.mrb[0].mxu0 %v713_v3  ;;  %1360 = vmatmul.mubr.f32.vlgmr.msra.gmra.mrb[0].mxu1 %v729_v4  ;;  %v1476_v61 = vunpack.i.h.bf16 %v1474_v5  ;;  %v1475_v40 = vunpack.i.l.bf16 %v1474_v5  ;;  %v1471_v9 = vunpack.i.h.bf16 %v1469_v6  ;;  %v1470_v10 = vunpack.i.l.bf16 %v1469_v6 }
  0x89   :  { %v648_v28 = vsel %vm645_vm3, %v1803_v41, %v1470_v10  ;;  %v664_v24 = vsel %vm645_vm3, %v1808_v42, %v1471_v9  ;;  %v649_v29 = vsel %vm645_vm3, %v1775_v25, %v1475_v40  ;;  %v665_v30 = vsel %vm645_vm3, %v1791_v35, %v1476_v61 }
  0x8a   :  { %v1484_v11 = vpop.permute.xlu1 %1483  ;;  %v1479_v12 = vpop.permute.xlu0 %1478 }
  0x8b   :  { %v1486_v15 = vunpack.i.h.bf16 %v1484_v11  ;;  %v1485_v19 = vunpack.i.l.bf16 %v1484_v11  ;;  %v1481_v23 = vunpack.i.h.bf16 %v1479_v12  ;;  %v1480_v26 = vunpack.i.l.bf16 %v1479_v12 }
  0x8d   :  { %v681_v43 = vsel %vm678_vm4, %v648_v28, %v1480_v26  ;;  %v697_v46 = vsel %vm678_vm4, %v664_v24, %v1481_v23  ;;  %v682_v47 = vsel %vm678_vm4, %v649_v29, %v1485_v19  ;;  %v698_v41 = vsel %vm678_vm4, %v665_v30, %v1486_v15 }
  0x8e   :  { %v1494_v27 = vpop.permute.xlu1 %1493  ;;  %v1489_v22 = vpop.permute.xlu0 %1488 }
  0x8f   :  { %v1496_v34 = vunpack.i.h.bf16 %v1494_v27  ;;  %v1495_v36 = vunpack.i.l.bf16 %v1494_v27  ;;  %v1491_v37 = vunpack.i.h.bf16 %v1489_v22  ;;  %v1490_v39 = vunpack.i.l.bf16 %v1489_v22 }
  0x91   :  { %v714_v42 = vsel %vm711_vm5, %v681_v43, %v1490_v39  ;;  %v730_v32 = vsel %vm711_vm5, %v697_v46, %v1491_v37  ;;  %v715_v25 = vsel %vm711_vm5, %v682_v47, %v1495_v36  ;;  %v731_v35 = vsel %vm711_vm5, %v698_v41, %v1496_v34 }
  0x92   :  { %v1504_v18 = vpop.permute.xlu1 %1503  ;;  %v1499_v52 = vpop.permute.xlu0 %1498  ;;  %1338 = vmatprep.mubr.f32.mxu0 %v714_v42  ;;  %1362 = vmatprep.mubr.f32.mxu1 %v730_v32 }
  0x93   :  { %1339 = vmatmul.mubr.f32.gmra.mrb[2].mxu0 %v715_v25  ;;  %1363 = vmatmul.mubr.f32.gmra.mrb[2].mxu1 %v731_v35  ;;  %v1506_v49 = vunpack.i.h.bf16 %v1504_v18  ;;  %v1505_v0 = vunpack.i.l.bf16 %v1504_v18  ;;  %v1501_v55 = vunpack.i.h.bf16 %v1499_v52  ;;  %v1500_v2 = vunpack.i.l.bf16 %v1499_v52 }
  0x95   :  { %v650_v9 = vsel %vm645_vm3, %v1862_v20, %v1500_v2  ;;  %v666_v10 = vsel %vm645_vm3, %v1867_v21, %v1501_v55  ;;  %v651_v11 = vsel %vm645_vm3, %v1832_v7, %v1505_v0  ;;  %v667_v12 = vsel %vm645_vm3, %v1848_v13, %v1506_v49 }
  0x96   :  { %v1514_v1 = vpop.permute.xlu1 %1513  ;;  %v1509_v63 = vpop.permute.xlu0 %1508 }
  0x97   :  { %v1516_v3 = vunpack.i.h.bf16 %v1514_v1  ;;  %v1515_v4 = vunpack.i.l.bf16 %v1514_v1  ;;  %v1511_v5 = vunpack.i.h.bf16 %v1509_v63  ;;  %v1510_v6 = vunpack.i.l.bf16 %v1509_v63 }
  0x99   :  { %v683_v27 = vsel %vm678_vm4, %v650_v9, %v1510_v6  ;;  %v699_v22 = vsel %vm678_vm4, %v666_v10, %v1511_v5  ;;  %v684_v28 = vsel %vm678_vm4, %v651_v11, %v1515_v4  ;;  %v700_v20 = vsel %vm678_vm4, %v667_v12, %v1516_v3 }
  0x9a   :  { %v1524_v61 = vpop.permute.xlu1 %1523  ;;  %v1519_v40 = vpop.permute.xlu0 %1518 }
  0x9b   :  { %v1526_v15 = vunpack.i.h.bf16 %v1524_v61  ;;  %v1525_v19 = vunpack.i.l.bf16 %v1524_v61  ;;  %v1521_v23 = vunpack.i.h.bf16 %v1519_v40  ;;  %v1520_v26 = vunpack.i.l.bf16 %v1519_v40 }
  0x9d   :  { %v716_v21 = vsel %vm711_vm5, %v683_v27, %v1520_v26  ;;  %v732_v24 = vsel %vm711_vm5, %v699_v22, %v1521_v23  ;;  %v717_v7 = vsel %vm711_vm5, %v684_v28, %v1525_v19  ;;  %v733_v13 = vsel %vm711_vm5, %v700_v20, %v1526_v15 }
  0x9e   :  { %v1534_v29 = vpop.permute.xlu1 %1533  ;;  %v1529_v30 = vpop.permute.xlu0 %1528  ;;  %1341 = vmatprep.mubr.f32.mxu0 %v716_v21  ;;  %1365 = vmatprep.mubr.f32.mxu1 %v732_v24 }
  0x9f   :  { %1342 = vmatmul.mubr.f32.gmra.mrb[4].mxu0 %v717_v7  ;;  %1366 = vmatmul.mubr.f32.gmra.mrb[4].mxu1 %v733_v13  ;;  %v1536_v34 = vunpack.i.h.bf16 %v1534_v29  ;;  %v1535_v36 = vunpack.i.l.bf16 %v1534_v29  ;;  %v1531_v37 = vunpack.i.h.bf16 %v1529_v30  ;;  %v1530_v39 = vunpack.i.l.bf16 %v1529_v30 }
  0xa1   :  { %v652_v18 = vsel %vm645_vm3, %v1922_v62, %v1530_v39  ;;  %v668_v52 = vsel %vm645_vm3, %v1933_v8, %v1531_v37  ;;  %v653_v49 = vsel %vm645_vm3, %v1896_v50, %v1535_v36  ;;  %v669_v0 = vsel %vm645_vm3, %v1908_v56, %v1536_v34 }
  0xa2   :  { %v1544_v43 = vpop.permute.xlu1 %1543  ;;  %v1539_v46 = vpop.permute.xlu0 %1538 }
  0xa3   :  { %v1546_v47 = vunpack.i.h.bf16 %v1544_v43  ;;  %v1545_v41 = vunpack.i.l.bf16 %v1544_v43  ;;  %v1541_v42 = vunpack.i.h.bf16 %v1539_v46  ;;  %v1540_v32 = vunpack.i.l.bf16 %v1539_v46 }
  0xa5   :  { %v685_v3 = vsel %vm678_vm4, %v652_v18, %v1540_v32  ;;  %v701_v4 = vsel %vm678_vm4, %v668_v52, %v1541_v42  ;;  %v686_v5 = vsel %vm678_vm4, %v653_v49, %v1545_v41  ;;  %v702_v62 = vsel %vm678_vm4, %v669_v0, %v1546_v47 }
  0xa6   :  { %v1554_v25 = vpop.permute.xlu1 %1553  ;;  %v1549_v35 = vpop.permute.xlu0 %1548 }
  0xa7   :  { %v1556_v55 = vunpack.i.h.bf16 %v1554_v25  ;;  %v1555_v2 = vunpack.i.l.bf16 %v1554_v25  ;;  %v1551_v1 = vunpack.i.h.bf16 %v1549_v35  ;;  %v1550_v63 = vunpack.i.l.bf16 %v1549_v35 }
  0xa9   :  { %v718_v8 = vsel %vm711_vm5, %v685_v3, %v1550_v63  ;;  %v734_v6 = vsel %vm711_vm5, %v701_v4, %v1551_v1  ;;  %v719_v50 = vsel %vm711_vm5, %v686_v5, %v1555_v2  ;;  %v735_v56 = vsel %vm711_vm5, %v702_v62, %v1556_v55 }
  0xaa   :  { %v1564_v61 = vpop.permute.xlu1 %1563  ;;  %v1559_v40 = vpop.permute.xlu0 %1558  ;;  %1344 = vmatprep.mubr.f32.mxu0 %v718_v8  ;;  %1368 = vmatprep.mubr.f32.mxu1 %v734_v6 }
  0xab   :  { %1345 = vmatmul.mubr.f32.gmra.mrb[6].mxu0 %v719_v50  ;;  %1369 = vmatmul.mubr.f32.gmra.mrb[6].mxu1 %v735_v56  ;;  %v1566_v9 = vunpack.i.h.bf16 %v1564_v61  ;;  %v1565_v10 = vunpack.i.l.bf16 %v1564_v61  ;;  %v1561_v11 = vunpack.i.h.bf16 %v1559_v40  ;;  %v1560_v12 = vunpack.i.l.bf16 %v1559_v40 }
  0xad   :  { %v654_v21 = vsel %vm645_vm3, %v1990_v59, %v1560_v12  ;;  %v670_v24 = vsel %vm645_vm3, %v1996_v57, %v1561_v11  ;;  %v655_v7 = vsel %vm645_vm3, %v1968_v48, %v1565_v10  ;;  %v671_v13 = vsel %vm645_vm3, %v1976_v51, %v1566_v9 }
  0xae   :  { %v1574_v15 = vpop.permute.xlu1 %1573  ;;  %v1569_v19 = vpop.permute.xlu0 %1568 }
  0xaf   :  { %v1576_v23 = vunpack.i.h.bf16 %v1574_v15  ;;  %v1575_v26 = vunpack.i.l.bf16 %v1574_v15  ;;  %v1571_v27 = vunpack.i.h.bf16 %v1569_v19  ;;  %v1570_v22 = vunpack.i.l.bf16 %v1569_v19 }
  0xb1   :  { %v687_v37 = vsel %vm678_vm4, %v654_v21, %v1570_v22  ;;  %v703_v39 = vsel %vm678_vm4, %v670_v24, %v1571_v27  ;;  %v688_v43 = vsel %vm678_vm4, %v655_v7, %v1575_v26  ;;  %v704_v59 = vsel %vm678_vm4, %v671_v13, %v1576_v23 }
  0xb2   :  { %v1584_v28 = vpop.permute.xlu1 %1583  ;;  %v1579_v20 = vpop.permute.xlu0 %1578 }
  0xb3   :  { %v1586_v29 = vunpack.i.h.bf16 %v1584_v28  ;;  %v1585_v30 = vunpack.i.l.bf16 %v1584_v28  ;;  %v1581_v34 = vunpack.i.h.bf16 %v1579_v20  ;;  %v1580_v36 = vunpack.i.l.bf16 %v1579_v20 }
  0xb5   :  { %v720_v57 = vsel %vm711_vm5, %v687_v37, %v1580_v36  ;;  %v736_v46 = vsel %vm711_vm5, %v703_v39, %v1581_v34  ;;  %v721_v48 = vsel %vm711_vm5, %v688_v43, %v1585_v30  ;;  %v737_v51 = vsel %vm711_vm5, %v704_v59, %v1586_v29 }
  0xb6   :  { %v1594_v47 = vpop.permute.xlu1 %1593  ;;  %v1589_v41 = vpop.permute.xlu0 %1588  ;;  %1347 = vmatprep.mubr.f32.mxu0 %v720_v57  ;;  %1371 = vmatprep.mubr.f32.mxu1 %v736_v46 }
  0xb7   :  { %1348 = vmatmul.mubr.f32.gmra.mrb[8].mxu0 %v721_v48  ;;  %1372 = vmatmul.mubr.f32.gmra.mrb[8].mxu1 %v737_v51  ;;  %v1596_v42 = vunpack.i.h.bf16 %v1594_v47  ;;  %v1595_v32 = vunpack.i.l.bf16 %v1594_v47  ;;  %v1591_v25 = vunpack.i.h.bf16 %v1589_v41  ;;  %v1590_v35 = vunpack.i.l.bf16 %v1589_v41 }
  0xb9   :  { %v656_v3 = vsel %vm645_vm3, %v2046_v53, %v1590_v35  ;;  %v672_v4 = vsel %vm645_vm3, %v2051_v54, %v1591_v25  ;;  %v657_v5 = vsel %vm645_vm3, %v2024_v38, %v1595_v32  ;;  %v673_v62 = vsel %vm645_vm3, %v2034_v44, %v1596_v42 }
  0xba   :  { %v1604_v18 = vpop.permute.xlu1 %1603  ;;  %v1599_v52 = vpop.permute.xlu0 %1598 }
  0xbb   :  { %v1606_v49 = vunpack.i.h.bf16 %v1604_v18  ;;  %v1605_v0 = vunpack.i.l.bf16 %v1604_v18  ;;  %v1601_v55 = vunpack.i.h.bf16 %v1599_v52  ;;  %v1600_v2 = vunpack.i.l.bf16 %v1599_v52 }
  0xbd   :  { %v689_v61 = vsel %vm678_vm4, %v656_v3, %v1600_v2  ;;  %v705_v40 = vsel %vm678_vm4, %v672_v4, %v1601_v55  ;;  %v690_v9 = vsel %vm678_vm4, %v657_v5, %v1605_v0  ;;  %v706_v53 = vsel %vm678_vm4, %v673_v62, %v1606_v49 }
  0xbe   :  { %v1614_v1 = vpop.permute.xlu1 %1613  ;;  %v1609_v63 = vpop.permute.xlu0 %1608 }
  0xbf   :  { %v1616_v8 = vunpack.i.h.bf16 %v1614_v1  ;;  %v1615_v6 = vunpack.i.l.bf16 %v1614_v1  ;;  %v1611_v50 = vunpack.i.h.bf16 %v1609_v63  ;;  %v1610_v56 = vunpack.i.l.bf16 %v1609_v63 }
  0xc1   :  { %v722_v54 = vsel %vm711_vm5, %v689_v61, %v1610_v56  ;;  %v738_v10 = vsel %vm711_vm5, %v705_v40, %v1611_v50  ;;  %v723_v38 = vsel %vm711_vm5, %v690_v9, %v1615_v6  ;;  %v739_v44 = vsel %vm711_vm5, %v706_v53, %v1616_v8 }
  0xc2   :  { %v1624_v11 = vpop.permute.xlu1 %1623  ;;  %v1619_v12 = vpop.permute.xlu0 %1618  ;;  %1350 = vmatprep.mubr.f32.mxu0 %v722_v54  ;;  %1374 = vmatprep.mubr.f32.mxu1 %v738_v10  ;;  %v985_v54 = vlaneseq }
  0xc3   :  { %1351 = vmatmul.mubr.f32.gmra.mrb[10].mxu0 %v723_v38  ;;  %1375 = vmatmul.mubr.f32.gmra.mrb[10].mxu1 %v739_v44  ;;  %v1626_v15 = vunpack.i.h.bf16 %v1624_v11  ;;  %v1625_v19 = vunpack.i.l.bf16 %v1624_v11  ;;  %v1621_v23 = vunpack.i.h.bf16 %v1619_v12  ;;  %v1620_v26 = vunpack.i.l.bf16 %v1619_v12  ;;  %v1253_v44 = vld [vmem:[%s2512_s3] ss:$0 sm:$0xff] }
  0xc4   :  { %v986_v10 = vshrl.u32 %v985_v54, 7 }
  0xc5   :  { %v658_v29 = vsel %vm645_vm3, %v2103_v45, %v1620_v26  ;;  %v674_v30 = vsel %vm645_vm3, %v2112_v60, %v1621_v23  ;;  %v659_v34 = vsel %vm645_vm3, %v2077_v31, %v1625_v19  ;;  %v675_v36 = vsel %vm645_vm3, %v2087_v33, %v1626_v15 }
  0xc6   :  { %v1634_v27 = vpop.permute.xlu1 %1633  ;;  %v1629_v22 = vpop.permute.xlu0 %1628  ;;  %v987_v38 = vadd.s32 8, %v986_v10  ;;  %vm2408_vm7 = vcmp.lt.s32.totalorder %v986_v10, %v1253_v44 }
  0xc7   :  { %v1636_v28 = vunpack.i.h.bf16 %v1634_v27  ;;  %v1635_v20 = vunpack.i.l.bf16 %v1634_v27  ;;  %v1631_v21 = vunpack.i.h.bf16 %v1629_v22  ;;  %v1630_v24 = vunpack.i.l.bf16 %v1629_v22 }
  0xc8   :  { %vm2404_vm6 = vcmp.lt.s32.totalorder %v987_v38, %v1253_v44 }
  0xc9   :  { %v691_v57 = vsel %vm678_vm4, %v658_v29, %v1630_v24  ;;  %v707_v46 = vsel %vm678_vm4, %v674_v30, %v1631_v21  ;;  %v692_v48 = vsel %vm678_vm4, %v659_v34, %v1635_v20  ;;  %v708_v45 = vsel %vm678_vm4, %v675_v36, %v1636_v28 }
  0xca   :  { %v1644_v7 = vpop.permute.xlu1 %1643  ;;  %v1639_v13 = vpop.permute.xlu0 %1638 }
  0xcb   :  { %v1646_v37 = vunpack.i.h.bf16 %v1644_v7  ;;  %v1645_v39 = vunpack.i.l.bf16 %v1644_v7  ;;  %v1641_v43 = vunpack.i.h.bf16 %v1639_v13  ;;  %v1640_v59 = vunpack.i.l.bf16 %v1639_v13 }
  0xcd   :  { %v724_v60 = vsel %vm711_vm5, %v691_v57, %v1640_v59  ;;  %v740_v51 = vsel %vm711_vm5, %v707_v46, %v1641_v43  ;;  %v725_v31 = vsel %vm711_vm5, %v692_v48, %v1645_v39  ;;  %v741_v33 = vsel %vm711_vm5, %v708_v45, %v1646_v37 }
  0xce   :  { %v1654_v47 = vpop.permute.xlu1 %1653  ;;  %v1649_v41 = vpop.permute.xlu0 %1648  ;;  %1353 = vmatprep.mubr.f32.mxu0 %v724_v60  ;;  %1377 = vmatprep.mubr.f32.mxu1 %v740_v51 }
  0xcf   :  { %1354 = vmatmul.mubr.f32.gmra.mrb[12].mxu0 %v725_v31  ;;  %1378 = vmatmul.mubr.f32.gmra.mrb[12].mxu1 %v741_v33  ;;  %v1656_v42 = vunpack.i.h.bf16 %v1654_v47  ;;  %v1655_v32 = vunpack.i.l.bf16 %v1654_v47  ;;  %v1651_v25 = vunpack.i.h.bf16 %v1649_v41  ;;  %v1650_v35 = vunpack.i.l.bf16 %v1649_v41 }
  0xd1   :  { %v660_v3 = vsel %vm645_vm3, %v2191_v16, %v1650_v35  ;;  %v676_v4 = vsel %vm645_vm3, %v2196_v17, %v1651_v25  ;;  %v661_v5 = vsel %vm645_vm3, %v2156_v58, %v1655_v32  ;;  %v677_v62 = vsel %vm645_vm3, %v2180_v14, %v1656_v42 }
  0xd2   :  { %v1664_v18 = vpop.permute.xlu1 %1663  ;;  %v1659_v52 = vpop.permute.xlu0 %1658 }
  0xd3   :  { %v1666_v49 = vunpack.i.h.bf16 %v1664_v18  ;;  %v1665_v0 = vunpack.i.l.bf16 %v1664_v18  ;;  %v1661_v55 = vunpack.i.h.bf16 %v1659_v52  ;;  %v1660_v2 = vunpack.i.l.bf16 %v1659_v52 }
  0xd5   :  { %v693_v61 = vsel %vm678_vm4, %v660_v3, %v1660_v2  ;;  %v709_v40 = vsel %vm678_vm4, %v676_v4, %v1661_v55  ;;  %v694_v9 = vsel %vm678_vm4, %v661_v5, %v1665_v0  ;;  %v710_v16 = vsel %vm678_vm4, %v677_v62, %v1666_v49 }
  0xd6   :  { %v1674_v1 = vpop.permute.xlu1 %1673  ;;  %v1669_v63 = vpop.permute.xlu0 %1668 }
  0xd7   :  { %v1676_v8 = vunpack.i.h.bf16 %v1674_v1  ;;  %v1675_v6 = vunpack.i.l.bf16 %v1674_v1  ;;  %v1671_v50 = vunpack.i.h.bf16 %v1669_v63  ;;  %v1670_v56 = vunpack.i.l.bf16 %v1669_v63 }
  0xd9   :  { %v726_v17 = vsel %vm711_vm5, %v693_v61, %v1670_v56  ;;  %v742_v53 = vsel %vm711_vm5, %v709_v40, %v1671_v50  ;;  %v727_v58 = vsel %vm711_vm5, %v694_v9, %v1675_v6  ;;  %v743_v14 = vsel %vm711_vm5, %v710_v16, %v1676_v8  ;;  %v2439_v61 = vld [vmem:[%s2511_s2] ss:$0 sm:$0xff]  ;;  %s1704_s2 = smov [#allocation2]  }
  0xda   :  { %1356 = vmatprep.mubr.f32.mxu0 %v726_v17  ;;  %1380 = vmatprep.mubr.f32.mxu1 %v742_v53  ;;  %s1242_s26 = sshll.u32 %s1704_s2, 4  ;;  %s1243_s26 = int_to_ptr.vmem [resolvable:$true] %s1242_s26 }
  0xdb   :  { %1357 = vmatmul.mubr.f32.gmra.mrb[14].mxu0 %v727_v58  ;;  %1381 = vmatmul.mubr.f32.gmra.mrb[14].mxu1 %v743_v14  ;;  %s1677_s27 = scalar_lea.vmem %s1243_s26, 256  ;;  %p1682_p1 = scmp.lt.s32.totalorder %s1243_s26, %s1243_s26 }
  0xdc   :  { %p1678_p0 = scmp.ne.s32.totalorder %s1243_s26, %s1677_s27  ;;  %p1683_p2 = scmp.lt.s32.totalorder %s1677_s27, %s1677_s27 }
  0xde   :  { %p1684_p3 = por %p1683_p2, %p1682_p1 }
  0xe0   :  { %p1685_p4 = pnand %p1684_p3, %p1678_p0 }
 0x15a   :  { %v1337_v15 = vpop.f32.mrb[0].mxu0  ;;  %v1361_v19 = vpop.f32.mrb[0].mxu1 }
 0x15b   :  { %v1000_v23 = vsel %vm2404_vm6, %v1337_v15, -3.4028235e+38  ;;  %v1016_v26 = vsel %vm2404_vm6, %v1361_v19, -3.4028235e+38  ;;  %v826_v27 = vpop.f32.mrb[1].mxu0  ;;  %v906_v22 = vpop.f32.mrb[1].mxu1 }
 0x15c   :  { %v999_v28 = vsel %vm2408_vm7, %v826_v27, -3.4028235e+38  ;;  %v1015_v20 = vsel %vm2408_vm7, %v906_v22, -3.4028235e+38 }
 0x15d   :  { %v1031_v21 = vmax.f32 %v999_v28, %v1000_v23  ;;  %v1087_v24 = vmax.f32 %v1015_v20, %v1016_v26 }
 0x15f   :  { %v1032_v7 = vrot.slane %v1031_v21, 4  ;;  %v1088_v13 = vrot.slane %v1087_v24, 4 }
 0x161   :  { %v1033_v29 = vmax.f32 %v1031_v21, %v1032_v7  ;;  %v1089_v30 = vmax.f32 %v1087_v24, %v1088_v13 }
 0x163   :  { %v1034_v37 = vrot.slane %v1033_v29, 2  ;;  %v1090_v39 = vrot.slane %v1089_v30, 2 }
 0x165   :  { %v1035_v31 = vmax.f32 %v1033_v29, %v1034_v37  ;;  %v1091_v33 = vmax.f32 %v1089_v30, %v1090_v39 }
 0x166   :  { %v1340_v34 = vpop.f32.mrb[2].mxu0  ;;  %v1364_v36 = vpop.f32.mrb[2].mxu1 }
 0x167   :  { %v1002_v43 = vsel %vm2404_vm6, %v1340_v34, -3.4028235e+38  ;;  %v1018_v59 = vsel %vm2404_vm6, %v1364_v36, -3.4028235e+38  ;;  %v836_v57 = vpop.f32.mrb[3].mxu0  ;;  %v916_v46 = vpop.f32.mrb[3].mxu1 }
 0x168   :  { %v1001_v48 = vsel %vm2408_vm7, %v836_v57, -3.4028235e+38  ;;  %v1017_v45 = vsel %vm2408_vm7, %v916_v46, -3.4028235e+38  ;;  %v1036_v25 = vrot.slane %v1035_v31, 1  ;;  %v1092_v35 = vrot.slane %v1091_v33, 1 }
 0x169   :  { %v1038_v60 = vmax.f32 %v1001_v48, %v1002_v43  ;;  %v1094_v51 = vmax.f32 %v1017_v45, %v1018_v59 }
 0x16a   :  { %v1037_v1 = vmax.f32 %v1035_v31, %v1036_v25  ;;  %v1093_v63 = vmax.f32 %v1091_v33, %v1092_v35 }
 0x16b   :  { %v1039_v47 = vrot.slane %v1038_v60, 4  ;;  %v1095_v41 = vrot.slane %v1094_v51, 4 }
 0x16c   :  { %v1150_v14 = vadd.f32 %v2439_v61, %v1037_v1  ;;  %v1158_v54 = vadd.f32 %v2439_v61, %v1093_v63 }
 0x16d   :  { %v1040_v42 = vmax.f32 %v1038_v60, %v1039_v47  ;;  %v1096_v32 = vmax.f32 %v1094_v51, %v1095_v41 }
 0x16e   :  { %v1166_v22 = vmax.f32 %v1150_v14, 0.0  ;;  %v1174_v28 = vmax.f32 %v1158_v54, 0.0 }
 0x16f   :  { %v1041_v18 = vrot.slane %v1040_v42, 2  ;;  %v1097_v52 = vrot.slane %v1096_v32, 2 }
 0x171   :  { %v1042_v49 = vmax.f32 %v1040_v42, %v1041_v18  ;;  %v1098_v0 = vmax.f32 %v1096_v32, %v1097_v52 }
 0x172   :  { %v1343_v55 = vpop.f32.mrb[4].mxu0  ;;  %v1367_v2 = vpop.f32.mrb[4].mxu1 }
 0x173   :  { %v1004_v3 = vsel %vm2404_vm6, %v1343_v55, -3.4028235e+38  ;;  %v1020_v4 = vsel %vm2404_vm6, %v1367_v2, -3.4028235e+38  ;;  %v846_v5 = vpop.f32.mrb[5].mxu0  ;;  %v926_v62 = vpop.f32.mrb[5].mxu1 }
 0x174   :  { %v1043_v8 = vrot.slane %v1042_v49, 1  ;;  %v1099_v6 = vrot.slane %v1098_v0, 1  ;;  %v1003_v50 = vsel %vm2408_vm7, %v846_v5, -3.4028235e+38  ;;  %v1019_v56 = vsel %vm2408_vm7, %v926_v62, -3.4028235e+38 }
 0x175   :  { %v1045_v40 = vmax.f32 %v1003_v50, %v1004_v3  ;;  %v1101_v9 = vmax.f32 %v1019_v56, %v1020_v4 }
 0x176   :  { %v1044_v16 = vmax.f32 %v1042_v49, %v1043_v8  ;;  %v1100_v17 = vmax.f32 %v1098_v0, %v1099_v6 }
 0x177   :  { %v1046_v53 = vrot.slane %v1045_v40, 4  ;;  %v1102_v58 = vrot.slane %v1101_v9, 4 }
 0x178   :  { %v1151_v10 = vadd.f32 %v2439_v61, %v1044_v16  ;;  %v1159_v38 = vadd.f32 %v2439_v61, %v1100_v17 }
 0x179   :  { %v1047_v44 = vmax.f32 %v1045_v40, %v1046_v53  ;;  %v1103_v15 = vmax.f32 %v1101_v9, %v1102_v58 }
 0x17a   :  { %v1167_v19 = vmax.f32 %v1151_v10, 0.0  ;;  %v1175_v23 = vmax.f32 %v1159_v38, 0.0 }
 0x17b   :  { %v1048_v26 = vrot.slane %v1047_v44, 2  ;;  %v1104_v27 = vrot.slane %v1103_v15, 2 }
 0x17c   :  { %v1198_v20 = vrot.slane %v1167_v19, 7  ;;  %v1219_v21 = vrot.slane %v1175_v23, 7 }
 0x17d   :  { %v1049_v24 = vmax.f32 %v1047_v44, %v1048_v26  ;;  %v1105_v7 = vmax.f32 %v1103_v15, %v1104_v27 }
 0x17e   :  { %v1200_v13 = vsel %vm1199_vm8, %v1198_v20, %v1166_v22  ;;  %v1220_v29 = vsel %vm1199_vm8, %v1219_v21, %v1174_v28  ;;  %v1346_v30 = vpop.f32.mrb[6].mxu0  ;;  %v1370_v34 = vpop.f32.mrb[6].mxu1 }
 0x17f   :  { %v1050_v36 = vrot.slane %v1049_v24, 1  ;;  %v1106_v37 = vrot.slane %v1105_v7, 1  ;;  %v1006_v39 = vsel %vm2404_vm6, %v1346_v30, -3.4028235e+38  ;;  %v1022_v43 = vsel %vm2404_vm6, %v1370_v34, -3.4028235e+38 }
 0x180   :  { %v856_v59 = vpop.f32.mrb[7].mxu0  ;;  %v936_v57 = vpop.f32.mrb[7].mxu1 }
 0x181   :  { %v1051_v46 = vmax.f32 %v1049_v24, %v1050_v36  ;;  %v1107_v48 = vmax.f32 %v1105_v7, %v1106_v37  ;;  %v1005_v45 = vsel %vm2408_vm7, %v856_v59, -3.4028235e+38  ;;  %v1021_v60 = vsel %vm2408_vm7, %v936_v57, -3.4028235e+38 }
 0x182   :  { %v1052_v51 = vmax.f32 %v1005_v45, %v1006_v39  ;;  %v1108_v31 = vmax.f32 %v1021_v60, %v1022_v43 }
 0x183   :  { %v1152_v33 = vadd.f32 %v2439_v61, %v1051_v46  ;;  %v1160_v47 = vadd.f32 %v2439_v61, %v1107_v48 }
 0x184   :  { %v1053_v41 = vrot.slane %v1052_v51, 4  ;;  %v1109_v42 = vrot.slane %v1108_v31, 4 }
 0x185   :  { %v1168_v32 = vmax.f32 %v1152_v33, 0.0  ;;  %v1176_v25 = vmax.f32 %v1160_v47, 0.0 }
 0x186   :  { %v1054_v35 = vmax.f32 %v1052_v51, %v1053_v41  ;;  %v1110_v18 = vmax.f32 %v1108_v31, %v1109_v42 }
 0x187   :  { %v1201_v52 = vrot.slane %v1168_v32, 6  ;;  %v1221_v49 = vrot.slane %v1176_v25, 6 }
 0x188   :  { %v1055_v0 = vrot.slane %v1054_v35, 2  ;;  %v1111_v55 = vrot.slane %v1110_v18, 2 }
 0x189   :  { %v1203_v2 = vsel %vm1202_vm9, %v1201_v52, %v1200_v13  ;;  %v1222_v1 = vsel %vm1202_vm9, %v1221_v49, %v1220_v29 }
 0x18a   :  { %v1056_v63 = vmax.f32 %v1054_v35, %v1055_v0  ;;  %v1112_v3 = vmax.f32 %v1110_v18, %v1111_v55  ;;  %v1349_v4 = vpop.f32.mrb[8].mxu0  ;;  %v1373_v5 = vpop.f32.mrb[8].mxu1 }
 0x18b   :  { %v1008_v62 = vsel %vm2404_vm6, %v1349_v4, -3.4028235e+38  ;;  %v1024_v8 = vsel %vm2404_vm6, %v1373_v5, -3.4028235e+38  ;;  %v866_v6 = vpop.f32.mrb[9].mxu0  ;;  %v946_v50 = vpop.f32.mrb[9].mxu1 }
 0x18c   :  { %v1057_v56 = vrot.slane %v1056_v63, 1  ;;  %v1113_v40 = vrot.slane %v1112_v3, 1  ;;  %v1007_v9 = vsel %vm2408_vm7, %v866_v6, -3.4028235e+38  ;;  %v1023_v16 = vsel %vm2408_vm7, %v946_v50, -3.4028235e+38 }
 0x18d   :  { %v1059_v17 = vmax.f32 %v1007_v9, %v1008_v62  ;;  %v1115_v53 = vmax.f32 %v1023_v16, %v1024_v8 }
 0x18e   :  { %v1058_v58 = vmax.f32 %v1056_v63, %v1057_v56  ;;  %v1114_v14 = vmax.f32 %v1112_v3, %v1113_v40 }
 0x18f   :  { %v1060_v54 = vrot.slane %v1059_v17, 4  ;;  %v1116_v10 = vrot.slane %v1115_v53, 4 }
 0x190   :  { %v1153_v38 = vadd.f32 %v2439_v61, %v1058_v58  ;;  %v1161_v44 = vadd.f32 %v2439_v61, %v1114_v14 }
 0x191   :  { %v1061_v15 = vmax.f32 %v1059_v17, %v1060_v54  ;;  %v1117_v19 = vmax.f32 %v1115_v53, %v1116_v10 }
 0x192   :  { %v1169_v23 = vmax.f32 %v1153_v38, 0.0  ;;  %v1177_v26 = vmax.f32 %v1161_v44, 0.0 }
 0x193   :  { %v1062_v27 = vrot.slane %v1061_v15, 2  ;;  %v1118_v22 = vrot.slane %v1117_v19, 2 }
 0x194   :  { %v1204_v28 = vrot.slane %v1169_v23, 5  ;;  %v1223_v20 = vrot.slane %v1177_v26, 5 }
 0x195   :  { %v1063_v21 = vmax.f32 %v1061_v15, %v1062_v27  ;;  %v1119_v24 = vmax.f32 %v1117_v19, %v1118_v22 }
 0x196   :  { %v1206_v7 = vsel %vm1205_vm10, %v1204_v28, %v1203_v2  ;;  %v1224_v13 = vsel %vm1205_vm10, %v1223_v20, %v1222_v1  ;;  %v1352_v29 = vpop.f32.mrb[10].mxu0  ;;  %v1376_v30 = vpop.f32.mrb[10].mxu1 }
 0x197   :  { %v1064_v34 = vrot.slane %v1063_v21, 1  ;;  %v1120_v36 = vrot.slane %v1119_v24, 1  ;;  %v1010_v37 = vsel %vm2404_vm6, %v1352_v29, -3.4028235e+38  ;;  %v1026_v39 = vsel %vm2404_vm6, %v1376_v30, -3.4028235e+38 }
 0x198   :  { %v876_v43 = vpop.f32.mrb[11].mxu0  ;;  %v956_v59 = vpop.f32.mrb[11].mxu1 }
 0x199   :  { %v1065_v57 = vmax.f32 %v1063_v21, %v1064_v34  ;;  %v1121_v46 = vmax.f32 %v1119_v24, %v1120_v36  ;;  %v1009_v48 = vsel %vm2408_vm7, %v876_v43, -3.4028235e+38  ;;  %v1025_v45 = vsel %vm2408_vm7, %v956_v59, -3.4028235e+38 }
 0x19a   :  { %v1066_v60 = vmax.f32 %v1009_v48, %v1010_v37  ;;  %v1122_v51 = vmax.f32 %v1025_v45, %v1026_v39 }
 0x19b   :  { %v1154_v31 = vadd.f32 %v2439_v61, %v1065_v57  ;;  %v1162_v33 = vadd.f32 %v2439_v61, %v1121_v46 }
 0x19c   :  { %v1067_v47 = vrot.slane %v1066_v60, 4  ;;  %v1123_v41 = vrot.slane %v1122_v51, 4 }
 0x19d   :  { %v1170_v42 = vmax.f32 %v1154_v31, 0.0  ;;  %v1178_v32 = vmax.f32 %v1162_v33, 0.0 }
 0x19e   :  { %v1068_v25 = vmax.f32 %v1066_v60, %v1067_v47  ;;  %v1124_v35 = vmax.f32 %v1122_v51, %v1123_v41 }
 0x19f   :  { %v1207_v18 = vrot.slane %v1170_v42, 4  ;;  %v1225_v52 = vrot.slane %v1178_v32, 4 }
 0x1a0   :  { %v1069_v49 = vrot.slane %v1068_v25, 2  ;;  %v1125_v0 = vrot.slane %v1124_v35, 2 }
 0x1a1   :  { %v1209_v55 = vsel %vm1208_vm11, %v1207_v18, %v1206_v7  ;;  %v1226_v2 = vsel %vm1208_vm11, %v1225_v52, %v1224_v13 }
 0x1a2   :  { %v1070_v1 = vmax.f32 %v1068_v25, %v1069_v49  ;;  %v1126_v63 = vmax.f32 %v1124_v35, %v1125_v0  ;;  %v1355_v3 = vpop.f32.mrb[12].mxu0  ;;  %v1379_v4 = vpop.f32.mrb[12].mxu1 }
 0x1a3   :  { %v1012_v5 = vsel %vm2404_vm6, %v1355_v3, -3.4028235e+38  ;;  %v1028_v62 = vsel %vm2404_vm6, %v1379_v4, -3.4028235e+38  ;;  %v886_v8 = vpop.f32.mrb[13].mxu0  ;;  %v966_v6 = vpop.f32.mrb[13].mxu1 }
 0x1a4   :  { %v1071_v50 = vrot.slane %v1070_v1, 1  ;;  %v1127_v56 = vrot.slane %v1126_v63, 1  ;;  %v1011_v40 = vsel %vm2408_vm7, %v886_v8, -3.4028235e+38  ;;  %v1027_v9 = vsel %vm2408_vm7, %v966_v6, -3.4028235e+38 }
 0x1a5   :  { %v1073_v16 = vmax.f32 %v1011_v40, %v1012_v5  ;;  %v1129_v17 = vmax.f32 %v1027_v9, %v1028_v62 }
 0x1a6   :  { %v1072_v53 = vmax.f32 %v1070_v1, %v1071_v50  ;;  %v1128_v58 = vmax.f32 %v1126_v63, %v1127_v56 }
 0x1a7   :  { %v1074_v14 = vrot.slane %v1073_v16, 4  ;;  %v1130_v54 = vrot.slane %v1129_v17, 4 }
 0x1a8   :  { %v1155_v10 = vadd.f32 %v2439_v61, %v1072_v53  ;;  %v1163_v38 = vadd.f32 %v2439_v61, %v1128_v58 }
 0x1a9   :  { %v1075_v44 = vmax.f32 %v1073_v16, %v1074_v14  ;;  %v1131_v15 = vmax.f32 %v1129_v17, %v1130_v54 }
 0x1aa   :  { %v1171_v19 = vmax.f32 %v1155_v10, 0.0  ;;  %v1179_v23 = vmax.f32 %v1163_v38, 0.0 }
 0x1ab   :  { %v1076_v26 = vrot.slane %v1075_v44, 2  ;;  %v1132_v27 = vrot.slane %v1131_v15, 2 }
 0x1ac   :  { %v1210_v22 = vrot.slane %v1171_v19, 3  ;;  %v1227_v28 = vrot.slane %v1179_v23, 3 }
 0x1ad   :  { %v1077_v20 = vmax.f32 %v1075_v44, %v1076_v26  ;;  %v1133_v21 = vmax.f32 %v1131_v15, %v1132_v27 }
 0x1ae   :  { %v1358_v24 = vpop.f32.mrb[14].mxu0  ;;  %v1382_v7 = vpop.f32.mrb[14].mxu1  ;;  %v1212_v13 = vsel %vm1211_vm12, %v1210_v22, %v1209_v55  ;;  %v1228_v29 = vsel %vm1211_vm12, %v1227_v28, %v1226_v2 }
 0x1af   :  { %v1078_v30 = vrot.slane %v1077_v20, 1  ;;  %v1134_v34 = vrot.slane %v1133_v21, 1  ;;  %v1014_v36 = vsel %vm2404_vm6, %v1358_v24, -3.4028235e+38  ;;  %v1030_v37 = vsel %vm2404_vm6, %v1382_v7, -3.4028235e+38 }
 0x1b0   :  { %v896_v39 = vpop.f32.mrb[15].mxu0  ;;  %v976_v43 = vpop.f32.mrb[15].mxu1 }
 0x1b1   :  { %v1079_v59 = vmax.f32 %v1077_v20, %v1078_v30  ;;  %v1135_v57 = vmax.f32 %v1133_v21, %v1134_v34  ;;  %v1013_v46 = vsel %vm2408_vm7, %v896_v39, -3.4028235e+38  ;;  %v1029_v48 = vsel %vm2408_vm7, %v976_v43, -3.4028235e+38 }
 0x1b2   :  { %v1080_v45 = vmax.f32 %v1013_v46, %v1014_v36  ;;  %v1136_v60 = vmax.f32 %v1029_v48, %v1030_v37 }
 0x1b3   :  { %v1156_v51 = vadd.f32 %v2439_v61, %v1079_v59  ;;  %v1164_v31 = vadd.f32 %v2439_v61, %v1135_v57 }
 0x1b4   :  { %v1081_v33 = vrot.slane %v1080_v45, 4  ;;  %v1137_v47 = vrot.slane %v1136_v60, 4 }
 0x1b5   :  { %v1172_v11 = vmax.f32 %v1156_v51, 0.0  ;;  %v1180_v41 = vmax.f32 %v1164_v31, 0.0 }
 0x1b6   :  { %v1082_v42 = vmax.f32 %v1080_v45, %v1081_v33  ;;  %v1138_v32 = vmax.f32 %v1136_v60, %v1137_v47 }
 0x1b7   :  { %v1213_v25 = vrot.slane %v1172_v11, 2  ;;  %v1229_v35 = vrot.slane %v1180_v41, 2 }
 0x1b8   :  { %v1083_v18 = vrot.slane %v1082_v42, 2  ;;  %v1139_v52 = vrot.slane %v1138_v32, 2 }
 0x1b9   :  { %v1215_v49 = vsel %vm1214_vm13, %v1213_v25, %v1212_v13  ;;  %v1230_v12 = vsel %vm1214_vm13, %v1229_v35, %v1228_v29 }
 0x1ba   :  { %v1084_v0 = vmax.f32 %v1082_v42, %v1083_v18  ;;  %v1140_v55 = vmax.f32 %v1138_v32, %v1139_v52 }
 0x1bc   :  { %v1085_v2 = vrot.slane %v1084_v0, 1  ;;  %v1141_v1 = vrot.slane %v1140_v55, 1 }
 0x1be   :  { %v1086_v63 = vmax.f32 %v1084_v0, %v1085_v2  ;;  %v1142_v3 = vmax.f32 %v1140_v55, %v1141_v1 }
 0x1c0   :  { %v1157_v4 = vadd.f32 %v2439_v61, %v1086_v63  ;;  %v1165_v5 = vadd.f32 %v2439_v61, %v1142_v3 }
 0x1c2   :  { %v1173_v62 = vmax.f32 %v1157_v4, 0.0  ;;  %v1181_v8 = vmax.f32 %v1165_v5, 0.0 }
 0x1c4   :  { %v1216_v6 = vrot.slane %v1173_v62, 1  ;;  %v1231_v50 = vrot.slane %v1181_v8, 1 }
 0x1c6   :  { %v1218_v56 = vsel %vm1217_vm14, %v1216_v6, %v1215_v49  ;;  %v1232_v40 = vsel %vm1217_vm14, %v1231_v50, %v1230_v12 }
 0x1c7   :  { %1235 = vst [vmem:[#allocation2] sm:$0xff] %v1218_v56  ;;  %1236 = vst [vmem:[#allocation2 + $0x8] sm:$0xff] %v1232_v40 }
 0x1c8   :  { %1688 = shalt.err (!%p1685_p4)
}
 0x1c9   :  { %s1689_s30 = scalar_lea.hbm %s2513_s4, 256 }
 0x1ca   :  { %p1690_p5 = scmp.ne.s32.totalorder %s2513_s4, %s1689_s30  ;;  %p1693_p6 = scmp.lt.u32.totalorder %s1689_s30, %s2513_s4 }
 0x1cc   :  { %p1695_p7 = pnand %p1693_p6, %p1690_p5 }
 0x1ce   :  { %1698 = shalt.err (!%p1695_p7)
}
 0x1cf   :  { %s1705_s10 = smov 128   ;;  %s1706_s11 = smov 8  }
 0x1d0   :  { %1248 = dma.vmem_to_hbm [thread:$0]  %s1243_s26, 256, %s2513_s4, [#allocation3], %s1705_s10, %s1705_s10, %s1706_s11  }
 0x1d1   :  { %1699 = dma.done.wait [#allocation3], 256  }
 0x1d2   :  { %1700 = vsyncadd [#allocation3], 4294967040 }
 0x1d3   :  { %1252 = vsyncpa [#allocation3], 1 }

</bundles_post_ra>
